<compile_context>
chip_gen: v7x
topology: tpu7x:2x2x1
jax: 0.10.0
libtpu: 0.0.40
codegen_flags: <defaults>
</compile_context>

<pallas_src>
import random

import jax
import jax.numpy as jnp
from jax.experimental import pallas as pl
from jax.experimental.pallas import tpu as pltpu


# ------------------------------ fused kernel ------------------------------- #
def make_fused_gru_forward(batch, in_steps, out_steps, num_layers, hidden, feat_pad):
    B, T, S, L, H, P = batch, in_steps, out_steps, num_layers, hidden, feat_pad

    def kernel(tf_ref, x_enc_ref, true_ref,
               ew_ref, eb_ref, dw_ref, db_ref,
               aw_ref, ab_ref, preds_ref):
        # ---- hoist every weight / bias / input read out of the loops -------
        ew = [ew_ref[l] for l in range(L)]                    # (P+H, 4H) bf16 each
        dw = [dw_ref[l] for l in range(L)]
        eb = [jnp.broadcast_to(eb_ref[l], (B, 4 * H)) for l in range(L)]   # f32
        db = [jnp.broadcast_to(db_ref[l], (B, 4 * H)) for l in range(L)]
        aw = aw_ref[...]                                      # (H, P) bf16
        ab = jnp.broadcast_to(ab_ref[...], (B, P))            # (B, P) f32
        x_enc = x_enc_ref[...]                                # (T*B, P) bf16
        true_all = true_ref[...]                              # (S, B, P) bf16

        # Layer-0 encoder weights split once: Wi rows feed the hoisted input
        # projection, Wh rows stay on the recurrent path.
        ewi0 = ew[0][:P, :]                                   # (P, 4H)
        ewh0 = ew[0][P:, :]                                   # (H, 4H)

        def gates_to_h(g, h):
            # g: (B, 4H) f32 with gate columns [r | z | n_input | n_hidden]
            rz = jax.nn.sigmoid(g[:, :2 * H])                 # one EUP pass
            r = rz[:, :H]
            z = rz[:, H:]
            n = jnp.tanh(g[:, 2 * H:3 * H] + r * g[:, 3 * H:4 * H])
            return (1.0 - z) * n + z * h

        def fused_cell(x, h, wcat, b):
            # Single (B, P+H) @ (P+H, 4H) dot per cell.
            xh = jnp.concatenate(
                [x.astype(jnp.bfloat16), h.astype(jnp.bfloat16)], axis=1)
            g = jnp.dot(xh, wcat, preferred_element_type=jnp.float32) + b
            return gates_to_h(g, h)

        # ------------------------------ encoder ------------------------------
        # Hoisted layer-0 input projection (bias pre-added): one big dot whose
        # M = T*B fills the bf16 vreg sublanes, removing T dependent dots from
        # the serial chain.
        gi0_all = (jnp.dot(x_enc, ewi0, preferred_element_type=jnp.float32)
                   + jnp.broadcast_to(eb_ref[0], (T * B, 4 * H)))  # (T*B, 4H)

        h = [jnp.zeros((B, H), jnp.float32) for _ in range(L)]
        for t in range(T):
            # Layer 0: only the recurrent dot sits on the dependency chain.
            g0 = (jnp.dot(h[0].astype(jnp.bfloat16), ewh0,
                          preferred_element_type=jnp.float32)
                  + gi0_all[t * B:(t + 1) * B])
            h[0] = gates_to_h(g0, h[0])
            xin = h[0]
            for l in range(1, L):
                h[l] = fused_cell(xin, h[l], ew[l], eb[l])
                xin = h[l]

        # ------------------------------ decoder ------------------------------
        x0 = x_enc[(T - 1) * B:, :]                           # last input step, bf16
        preds = []
        for t in range(S):
            xin = x0
            for l in range(L):
                h[l] = fused_cell(xin, h[l], dw[l], db[l])
                xin = h[l]
            data_out = (jnp.dot(h[L - 1].astype(jnp.bfloat16), aw,
                                preferred_element_type=jnp.float32)
                        + ab)                                  # (B, P); cols >= D are 0
            preds.append(data_out[:, 0:1])                     # pred = column 0
            # Teacher forcing: single select on an SMEM flag (no retrace).
            x0 = jnp.where(tf_ref[t] == 1, true_all[t],
                           data_out.astype(jnp.bfloat16))
        preds_ref[...] = jnp.concatenate(preds, axis=1)        # single (B, S) store

    vmem = pl.BlockSpec(memory_space=pltpu.MemorySpace.VMEM)
    smem = pl.BlockSpec(memory_space=pltpu.MemorySpace.SMEM)
    return pl.pallas_call(
        kernel,
        out_shape=jax.ShapeDtypeStruct((B, S), jnp.float32),
        in_specs=[smem] + [vmem] * 8,
        out_specs=vmem,
    )


# --------------------------- parameter creation ----------------------------- #
def init_gru_stack(key, input_size, hidden, num_layers, feat_pad):
    """Fused GRU params (PyTorch gate order r,z,n).

    Returns Wcat:(L, feat_pad+H, 4H) bf16 with rows [Wi(padded) ; Wh] and
    lane-dense gate columns [r | z | n_input | n_hidden], plus b:(L,1,4H) f32.
    r/z biases are pre-summed; b_in / b_hn stay separate so
    n = tanh(gi_n + r * gh_n) matches nn.GRU exactly.
    """
    H, P = hidden, feat_pad
    scale = 1.0 / float(H) ** 0.5
    w_l, b_l = [], []
    for layer in range(num_layers):
        din = input_size if layer == 0 else hidden
        key, k1, k2, k3, k4 = jax.random.split(key, 5)
        wi = jax.random.uniform(k1, (3, din, H), jnp.float32, -scale, scale)  # r,z,n
        wh = jax.random.uniform(k2, (3, H, H), jnp.float32, -scale, scale)
        bi = jax.random.uniform(k3, (3, H), jnp.float32, -scale, scale)
        bh = jax.random.uniform(k4, (3, H), jnp.float32, -scale, scale)

        wcat = jnp.zeros((P + H, 4 * H), jnp.float32)
        # Wi block (rows 0..P-1): columns [r | z | n_input | 0]
        wcat = wcat.at[:din, 0 * H:1 * H].set(wi[0])
        wcat = wcat.at[:din, 1 * H:2 * H].set(wi[1])
        wcat = wcat.at[:din, 2 * H:3 * H].set(wi[2])
        # Wh block (rows P..P+H-1): columns [r | z | 0 | n_hidden]
        wcat = wcat.at[P:, 0 * H:1 * H].set(wh[0])
        wcat = wcat.at[P:, 1 * H:2 * H].set(wh[1])
        wcat = wcat.at[P:, 3 * H:4 * H].set(wh[2])

        b = jnp.concatenate([bi[0] + bh[0], bi[1] + bh[1], bi[2], bh[2]])[None, :]
        w_l.append(wcat)
        b_l.append(b)
    return (jnp.stack(w_l).astype(jnp.bfloat16), jnp.stack(b_l)), key


def init_affine(key, hidden, total_dims, out_pad):
    scale = 1.0 / float(hidden) ** 0.5
    key, k1, k2 = jax.random.split(key, 3)
    w = jax.random.uniform(k1, (hidden, total_dims), jnp.float32, -scale, scale)
    b = jax.random.uniform(k2, (total_dims,), jnp.float32, -scale, scale)
    # Zero-pad output columns D -> out_pad so the affine output can feed the
    # decoder directly as the next (padded) input.
    w_p = jnp.zeros((hidden, out_pad), jnp.float32).at[:, :total_dims].set(w)
    b_p = jnp.zeros((1, out_pad), jnp.float32).at[:, :total_dims].set(b)
    return (w_p.astype(jnp.bfloat16), b_p), key


# ----------------------------------- main ----------------------------------- #
if __name__ == "__main__":
    batch_size = 2
    total_dims = 4
    hidden_dims = 32
    num_layers = 2
    input_steps = 8
    output_steps = 4
    teacher_forcing_ratio = 0.5
    feat_pad = hidden_dims            # layer-0 input zero-padded to width H
    assert feat_pad >= total_dims

    # Deterministic parameters.
    key = jax.random.PRNGKey(0)
    (enc_w, enc_b), key = init_gru_stack(key, total_dims, hidden_dims, num_layers, feat_pad)
    (dec_w, dec_b), key = init_gru_stack(key, total_dims, hidden_dims, num_layers, feat_pad)
    (aff_w, aff_b), key = init_affine(key, hidden_dims, total_dims, feat_pad)

    # Deterministic inputs.
    key, kin, kout = jax.random.split(key, 3)
    data_in = jax.random.normal(kin, (batch_size, input_steps, total_dims), jnp.float32)
    true_out = jax.random.normal(kout, (batch_size, output_steps, total_dims), jnp.float32)

    # Host-side layout prep: time-major, feature dim zero-padded D -> feat_pad,
    # cast to bf16 (the MXU operand dtype) so the kernel has no per-step casts.
    x_enc = jnp.zeros((input_steps * batch_size, feat_pad), jnp.float32)
    x_enc = x_enc.at[:, :total_dims].set(
        jnp.transpose(data_in, (1, 0, 2)).reshape(input_steps * batch_size, total_dims))
    x_enc = x_enc.astype(jnp.bfloat16)

    true_pad = jnp.zeros((output_steps, batch_size, feat_pad), jnp.float32)
    true_pad = true_pad.at[:, :, :total_dims].set(jnp.transpose(true_out, (1, 0, 2)))
    true_pad = true_pad.astype(jnp.bfloat16)

    # Teacher-forcing rolls: PyTorch draws random.random() per step; reproduce
    # host-side with a fixed seed and ship the rolls as device data (SMEM).
    random.seed(0)
    tf_flags = jnp.asarray(
        [1 if random.random() < teacher_forcing_ratio else 0
         for _ in range(output_steps)], jnp.int32)

    fwd = make_fused_gru_forward(batch_size, input_steps, output_steps,
                                 num_layers, hidden_dims, feat_pad)
    preds = fwd(tf_flags, x_enc, true_pad, enc_w, enc_b, dec_w, dec_b, aff_w, aff_b)
    preds = jax.block_until_ready(preds)
    preds = preds.reshape(batch_size, output_steps, 1)

    assert preds.shape == (batch_size, output_steps, 1)
    assert bool(jnp.all(jnp.isfinite(preds)))
    print("KERNEL_OK")
</pallas_src>

<mosaic_0001>
module attributes {stable_mosaic.version = 11 : i64} {
  func.func @kernel(%arg0: memref<4xi32, #tpu.memory_space<smem>>, %arg1: memref<16x32xbf16, #tpu.memory_space<vmem>>, %arg2: memref<4x2x32xbf16, #tpu.memory_space<vmem>>, %arg3: memref<2x64x128xbf16, #tpu.memory_space<vmem>>, %arg4: memref<2x1x128xf32, #tpu.memory_space<vmem>>, %arg5: memref<2x64x128xbf16, #tpu.memory_space<vmem>>, %arg6: memref<2x1x128xf32, #tpu.memory_space<vmem>>, %arg7: memref<32x32xbf16, #tpu.memory_space<vmem>>, %arg8: memref<1x32xf32, #tpu.memory_space<vmem>>, %arg9: memref<2x4xf32, #tpu.memory_space<vmem>>) attributes {dimension_semantics = [], scalar_prefetch = 0 : i64, scratch_operands = 0 : i64, tpu.core_type = #tpu.core_type<tc>} {
    %c0 = arith.constant 0 : index
    %c0_0 = arith.constant 0 : index
    %c0_1 = arith.constant 0 : index
    %0 = vector.load %arg3[%c0, %c0_0, %c0_1] : memref<2x64x128xbf16, #tpu.memory_space<vmem>>, vector<1x64x128xbf16>
    %1 = vector.shape_cast %0 : vector<1x64x128xbf16> to vector<64x128xbf16>
    %c1 = arith.constant 1 : index
    %c0_2 = arith.constant 0 : index
    %c0_3 = arith.constant 0 : index
    %2 = vector.load %arg3[%c1, %c0_2, %c0_3] : memref<2x64x128xbf16, #tpu.memory_space<vmem>>, vector<1x64x128xbf16>
    %3 = vector.shape_cast %2 : vector<1x64x128xbf16> to vector<64x128xbf16>
    %c0_4 = arith.constant 0 : index
    %c0_5 = arith.constant 0 : index
    %c0_6 = arith.constant 0 : index
    %4 = vector.load %arg5[%c0_4, %c0_5, %c0_6] : memref<2x64x128xbf16, #tpu.memory_space<vmem>>, vector<1x64x128xbf16>
    %5 = vector.shape_cast %4 : vector<1x64x128xbf16> to vector<64x128xbf16>
    %c1_7 = arith.constant 1 : index
    %c0_8 = arith.constant 0 : index
    %c0_9 = arith.constant 0 : index
    %6 = vector.load %arg5[%c1_7, %c0_8, %c0_9] : memref<2x64x128xbf16, #tpu.memory_space<vmem>>, vector<1x64x128xbf16>
    %7 = vector.shape_cast %6 : vector<1x64x128xbf16> to vector<64x128xbf16>
    %c1_10 = arith.constant 1 : index
    %c0_11 = arith.constant 0 : index
    %c0_12 = arith.constant 0 : index
    %8 = vector.load %arg4[%c1_10, %c0_11, %c0_12] : memref<2x1x128xf32, #tpu.memory_space<vmem>>, vector<1x1x128xf32>
    %9 = vector.shape_cast %8 : vector<1x1x128xf32> to vector<1x128xf32>
    %10 = vector.shape_cast %9 : vector<1x128xf32> to vector<1x128xf32>
    %11 = vector.broadcast %10 : vector<1x128xf32> to vector<2x128xf32>
    %c0_13 = arith.constant 0 : index
    %c0_14 = arith.constant 0 : index
    %c0_15 = arith.constant 0 : index
    %12 = vector.load %arg6[%c0_13, %c0_14, %c0_15] : memref<2x1x128xf32, #tpu.memory_space<vmem>>, vector<1x1x128xf32>
    %13 = vector.shape_cast %12 : vector<1x1x128xf32> to vector<1x128xf32>
    %14 = vector.shape_cast %13 : vector<1x128xf32> to vector<1x128xf32>
    %15 = vector.broadcast %14 : vector<1x128xf32> to vector<2x128xf32>
    %c1_16 = arith.constant 1 : index
    %c0_17 = arith.constant 0 : index
    %c0_18 = arith.constant 0 : index
    %16 = vector.load %arg6[%c1_16, %c0_17, %c0_18] : memref<2x1x128xf32, #tpu.memory_space<vmem>>, vector<1x1x128xf32>
    %17 = vector.shape_cast %16 : vector<1x1x128xf32> to vector<1x128xf32>
    %18 = vector.shape_cast %17 : vector<1x128xf32> to vector<1x128xf32>
    %19 = vector.broadcast %18 : vector<1x128xf32> to vector<2x128xf32>
    %c0_19 = arith.constant 0 : index
    %c0_20 = arith.constant 0 : index
    %20 = vector.load %arg7[%c0_19, %c0_20] : memref<32x32xbf16, #tpu.memory_space<vmem>>, vector<32x32xbf16>
    %c0_21 = arith.constant 0 : index
    %c0_22 = arith.constant 0 : index
    %21 = vector.load %arg8[%c0_21, %c0_22] : memref<1x32xf32, #tpu.memory_space<vmem>>, vector<1x32xf32>
    %22 = vector.shape_cast %21 : vector<1x32xf32> to vector<1x32xf32>
    %23 = vector.broadcast %22 : vector<1x32xf32> to vector<2x32xf32>
    %c0_23 = arith.constant 0 : index
    %c0_24 = arith.constant 0 : index
    %24 = vector.load %arg1[%c0_23, %c0_24] : memref<16x32xbf16, #tpu.memory_space<vmem>>, vector<16x32xbf16>
    %c0_25 = arith.constant 0 : index
    %c0_26 = arith.constant 0 : index
    %c0_27 = arith.constant 0 : index
    %25 = vector.load %arg2[%c0_25, %c0_26, %c0_27] : memref<4x2x32xbf16, #tpu.memory_space<vmem>>, vector<4x2x32xbf16>
    %26 = vector.extract_strided_slice %1 {offsets = [0, 0], sizes = [32, 128], strides = [1, 1]} : vector<64x128xbf16> to vector<32x128xbf16>
    %27 = vector.extract_strided_slice %1 {offsets = [32, 0], sizes = [32, 128], strides = [1, 1]} : vector<64x128xbf16> to vector<32x128xbf16>
    %cst = arith.constant dense<0.000000e+00> : vector<16x128xf32>
    %28 = tpu.matmul %24, %26, %cst {dimension_numbers = #tpu.dot_dimension_numbers<[1], [0], [0], [1], [0, 0, 1, 1], [], []>} : vector<16x32xbf16>, vector<32x128xbf16>, vector<16x128xf32> -> vector<16x128xf32>
    %c0_28 = arith.constant 0 : index
    %c0_29 = arith.constant 0 : index
    %c0_30 = arith.constant 0 : index
    %29 = vector.load %arg4[%c0_28, %c0_29, %c0_30] : memref<2x1x128xf32, #tpu.memory_space<vmem>>, vector<1x1x128xf32>
    %30 = vector.shape_cast %29 : vector<1x1x128xf32> to vector<1x128xf32>
    %31 = vector.shape_cast %30 : vector<1x128xf32> to vector<1x128xf32>
    %32 = vector.broadcast %31 : vector<1x128xf32> to vector<16x128xf32>
    %33 = arith.addf %28, %32 : vector<16x128xf32>
    %cst_31 = arith.constant 0.000000e+00 : f32
    %34 = vector.broadcast %cst_31 : f32 to vector<2x32xf32>
    %cst_32 = arith.constant 0.000000e+00 : f32
    %35 = vector.broadcast %cst_32 : f32 to vector<2x32xf32>
    %36 = arith.truncf %34 : vector<2x32xf32> to vector<2x32xbf16>
    %cst_33 = arith.constant dense<0.000000e+00> : vector<2x128xf32>
    %37 = tpu.matmul %36, %27, %cst_33 {dimension_numbers = #tpu.dot_dimension_numbers<[1], [0], [0], [1], [0, 0, 1, 1], [], []>} : vector<2x32xbf16>, vector<32x128xbf16>, vector<2x128xf32> -> vector<2x128xf32>
    %38 = vector.extract_strided_slice %33 {offsets = [0, 0], sizes = [2, 128], strides = [1, 1]} : vector<16x128xf32> to vector<2x128xf32>
    %39 = arith.addf %37, %38 : vector<2x128xf32>
    %40 = vector.extract_strided_slice %39 {offsets = [0, 0], sizes = [2, 64], strides = [1, 1]} : vector<2x128xf32> to vector<2x64xf32>
    %41 = arith.negf %40 : vector<2x64xf32>
    %42 = math.exp %41 : vector<2x64xf32>
    %cst_34 = arith.constant 1.000000e+00 : f32
    %43 = vector.broadcast %cst_34 : f32 to vector<2x64xf32>
    %44 = arith.addf %43, %42 : vector<2x64xf32>
    %45 = arith.divf %43, %44 : vector<2x64xf32>
    %46 = vector.extract_strided_slice %45 {offsets = [0, 0], sizes = [2, 32], strides = [1, 1]} : vector<2x64xf32> to vector<2x32xf32>
    %47 = vector.extract_strided_slice %45 {offsets = [0, 32], sizes = [2, 32], strides = [1, 1]} : vector<2x64xf32> to vector<2x32xf32>
    %48 = vector.extract_strided_slice %39 {offsets = [0, 64], sizes = [2, 32], strides = [1, 1]} : vector<2x128xf32> to vector<2x32xf32>
    %49 = vector.extract_strided_slice %39 {offsets = [0, 96], sizes = [2, 32], strides = [1, 1]} : vector<2x128xf32> to vector<2x32xf32>
    %50 = arith.mulf %46, %49 : vector<2x32xf32>
    %51 = arith.addf %48, %50 : vector<2x32xf32>
    %52 = math.tanh %51 : vector<2x32xf32>
    %cst_35 = arith.constant 1.000000e+00 : f32
    %53 = vector.broadcast %cst_35 : f32 to vector<2x32xf32>
    %54 = arith.subf %53, %47 : vector<2x32xf32>
    %55 = arith.mulf %54, %52 : vector<2x32xf32>
    %56 = arith.mulf %47, %34 : vector<2x32xf32>
    %57 = arith.addf %55, %56 : vector<2x32xf32>
    %58 = arith.truncf %57 : vector<2x32xf32> to vector<2x32xbf16>
    %59 = arith.truncf %35 : vector<2x32xf32> to vector<2x32xbf16>
    %60 = tpu.concatenate %58, %59 in 1 : vector<2x32xbf16>, vector<2x32xbf16> -> vector<2x64xbf16>
    %cst_36 = arith.constant dense<0.000000e+00> : vector<2x128xf32>
    %61 = tpu.matmul %60, %3, %cst_36 {dimension_numbers = #tpu.dot_dimension_numbers<[1], [0], [0], [1], [0, 0, 1, 1], [], []>} : vector<2x64xbf16>, vector<64x128xbf16>, vector<2x128xf32> -> vector<2x128xf32>
    %62 = arith.addf %61, %11 : vector<2x128xf32>
    %63 = vector.extract_strided_slice %62 {offsets = [0, 0], sizes = [2, 64], strides = [1, 1]} : vector<2x128xf32> to vector<2x64xf32>
    %64 = arith.negf %63 : vector<2x64xf32>
    %65 = math.exp %64 : vector<2x64xf32>
    %cst_37 = arith.constant 1.000000e+00 : f32
    %66 = vector.broadcast %cst_37 : f32 to vector<2x64xf32>
    %67 = arith.addf %66, %65 : vector<2x64xf32>
    %68 = arith.divf %66, %67 : vector<2x64xf32>
    %69 = vector.extract_strided_slice %68 {offsets = [0, 0], sizes = [2, 32], strides = [1, 1]} : vector<2x64xf32> to vector<2x32xf32>
    %70 = vector.extract_strided_slice %68 {offsets = [0, 32], sizes = [2, 32], strides = [1, 1]} : vector<2x64xf32> to vector<2x32xf32>
    %71 = vector.extract_strided_slice %62 {offsets = [0, 64], sizes = [2, 32], strides = [1, 1]} : vector<2x128xf32> to vector<2x32xf32>
    %72 = vector.extract_strided_slice %62 {offsets = [0, 96], sizes = [2, 32], strides = [1, 1]} : vector<2x128xf32> to vector<2x32xf32>
    %73 = arith.mulf %69, %72 : vector<2x32xf32>
    %74 = arith.addf %71, %73 : vector<2x32xf32>
    %75 = math.tanh %74 : vector<2x32xf32>
    %cst_38 = arith.constant 1.000000e+00 : f32
    %76 = vector.broadcast %cst_38 : f32 to vector<2x32xf32>
    %77 = arith.subf %76, %70 : vector<2x32xf32>
    %78 = arith.mulf %77, %75 : vector<2x32xf32>
    %79 = arith.mulf %70, %35 : vector<2x32xf32>
    %80 = arith.addf %78, %79 : vector<2x32xf32>
    %81 = arith.truncf %57 : vector<2x32xf32> to vector<2x32xbf16>
    %cst_39 = arith.constant dense<0.000000e+00> : vector<2x128xf32>
    %82 = tpu.matmul %81, %27, %cst_39 {dimension_numbers = #tpu.dot_dimension_numbers<[1], [0], [0], [1], [0, 0, 1, 1], [], []>} : vector<2x32xbf16>, vector<32x128xbf16>, vector<2x128xf32> -> vector<2x128xf32>
    %83 = vector.extract_strided_slice %33 {offsets = [2, 0], sizes = [2, 128], strides = [1, 1]} : vector<16x128xf32> to vector<2x128xf32>
    %84 = arith.addf %82, %83 : vector<2x128xf32>
    %85 = vector.extract_strided_slice %84 {offsets = [0, 0], sizes = [2, 64], strides = [1, 1]} : vector<2x128xf32> to vector<2x64xf32>
    %86 = arith.negf %85 : vector<2x64xf32>
    %87 = math.exp %86 : vector<2x64xf32>
    %cst_40 = arith.constant 1.000000e+00 : f32
    %88 = vector.broadcast %cst_40 : f32 to vector<2x64xf32>
    %89 = arith.addf %88, %87 : vector<2x64xf32>
    %90 = arith.divf %88, %89 : vector<2x64xf32>
    %91 = vector.extract_strided_slice %90 {offsets = [0, 0], sizes = [2, 32], strides = [1, 1]} : vector<2x64xf32> to vector<2x32xf32>
    %92 = vector.extract_strided_slice %90 {offsets = [0, 32], sizes = [2, 32], strides = [1, 1]} : vector<2x64xf32> to vector<2x32xf32>
    %93 = vector.extract_strided_slice %84 {offsets = [0, 64], sizes = [2, 32], strides = [1, 1]} : vector<2x128xf32> to vector<2x32xf32>
    %94 = vector.extract_strided_slice %84 {offsets = [0, 96], sizes = [2, 32], strides = [1, 1]} : vector<2x128xf32> to vector<2x32xf32>
    %95 = arith.mulf %91, %94 : vector<2x32xf32>
    %96 = arith.addf %93, %95 : vector<2x32xf32>
    %97 = math.tanh %96 : vector<2x32xf32>
    %cst_41 = arith.constant 1.000000e+00 : f32
    %98 = vector.broadcast %cst_41 : f32 to vector<2x32xf32>
    %99 = arith.subf %98, %92 : vector<2x32xf32>
    %100 = arith.mulf %99, %97 : vector<2x32xf32>
    %101 = arith.mulf %92, %57 : vector<2x32xf32>
    %102 = arith.addf %100, %101 : vector<2x32xf32>
    %103 = arith.truncf %102 : vector<2x32xf32> to vector<2x32xbf16>
    %104 = arith.truncf %80 : vector<2x32xf32> to vector<2x32xbf16>
    %105 = tpu.concatenate %103, %104 in 1 : vector<2x32xbf16>, vector<2x32xbf16> -> vector<2x64xbf16>
    %cst_42 = arith.constant dense<0.000000e+00> : vector<2x128xf32>
    %106 = tpu.matmul %105, %3, %cst_42 {dimension_numbers = #tpu.dot_dimension_numbers<[1], [0], [0], [1], [0, 0, 1, 1], [], []>} : vector<2x64xbf16>, vector<64x128xbf16>, vector<2x128xf32> -> vector<2x128xf32>
    %107 = arith.addf %106, %11 : vector<2x128xf32>
    %108 = vector.extract_strided_slice %107 {offsets = [0, 0], sizes = [2, 64], strides = [1, 1]} : vector<2x128xf32> to vector<2x64xf32>
    %109 = arith.negf %108 : vector<2x64xf32>
    %110 = math.exp %109 : vector<2x64xf32>
    %cst_43 = arith.constant 1.000000e+00 : f32
    %111 = vector.broadcast %cst_43 : f32 to vector<2x64xf32>
    %112 = arith.addf %111, %110 : vector<2x64xf32>
    %113 = arith.divf %111, %112 : vector<2x64xf32>
    %114 = vector.extract_strided_slice %113 {offsets = [0, 0], sizes = [2, 32], strides = [1, 1]} : vector<2x64xf32> to vector<2x32xf32>
    %115 = vector.extract_strided_slice %113 {offsets = [0, 32], sizes = [2, 32], strides = [1, 1]} : vector<2x64xf32> to vector<2x32xf32>
    %116 = vector.extract_strided_slice %107 {offsets = [0, 64], sizes = [2, 32], strides = [1, 1]} : vector<2x128xf32> to vector<2x32xf32>
    %117 = vector.extract_strided_slice %107 {offsets = [0, 96], sizes = [2, 32], strides = [1, 1]} : vector<2x128xf32> to vector<2x32xf32>
    %118 = arith.mulf %114, %117 : vector<2x32xf32>
    %119 = arith.addf %116, %118 : vector<2x32xf32>
    %120 = math.tanh %119 : vector<2x32xf32>
    %cst_44 = arith.constant 1.000000e+00 : f32
    %121 = vector.broadcast %cst_44 : f32 to vector<2x32xf32>
    %122 = arith.subf %121, %115 : vector<2x32xf32>
    %123 = arith.mulf %122, %120 : vector<2x32xf32>
    %124 = arith.mulf %115, %80 : vector<2x32xf32>
    %125 = arith.addf %123, %124 : vector<2x32xf32>
    %126 = arith.truncf %102 : vector<2x32xf32> to vector<2x32xbf16>
    %cst_45 = arith.constant dense<0.000000e+00> : vector<2x128xf32>
    %127 = tpu.matmul %126, %27, %cst_45 {dimension_numbers = #tpu.dot_dimension_numbers<[1], [0], [0], [1], [0, 0, 1, 1], [], []>} : vector<2x32xbf16>, vector<32x128xbf16>, vector<2x128xf32> -> vector<2x128xf32>
    %128 = vector.extract_strided_slice %33 {offsets = [4, 0], sizes = [2, 128], strides = [1, 1]} : vector<16x128xf32> to vector<2x128xf32>
    %129 = arith.addf %127, %128 : vector<2x128xf32>
    %130 = vector.extract_strided_slice %129 {offsets = [0, 0], sizes = [2, 64], strides = [1, 1]} : vector<2x128xf32> to vector<2x64xf32>
    %131 = arith.negf %130 : vector<2x64xf32>
    %132 = math.exp %131 : vector<2x64xf32>
    %cst_46 = arith.constant 1.000000e+00 : f32
    %133 = vector.broadcast %cst_46 : f32 to vector<2x64xf32>
    %134 = arith.addf %133, %132 : vector<2x64xf32>
    %135 = arith.divf %133, %134 : vector<2x64xf32>
    %136 = vector.extract_strided_slice %135 {offsets = [0, 0], sizes = [2, 32], strides = [1, 1]} : vector<2x64xf32> to vector<2x32xf32>
    %137 = vector.extract_strided_slice %135 {offsets = [0, 32], sizes = [2, 32], strides = [1, 1]} : vector<2x64xf32> to vector<2x32xf32>
    %138 = vector.extract_strided_slice %129 {offsets = [0, 64], sizes = [2, 32], strides = [1, 1]} : vector<2x128xf32> to vector<2x32xf32>
    %139 = vector.extract_strided_slice %129 {offsets = [0, 96], sizes = [2, 32], strides = [1, 1]} : vector<2x128xf32> to vector<2x32xf32>
    %140 = arith.mulf %136, %139 : vector<2x32xf32>
    %141 = arith.addf %138, %140 : vector<2x32xf32>
    %142 = math.tanh %141 : vector<2x32xf32>
    %cst_47 = arith.constant 1.000000e+00 : f32
    %143 = vector.broadcast %cst_47 : f32 to vector<2x32xf32>
    %144 = arith.subf %143, %137 : vector<2x32xf32>
    %145 = arith.mulf %144, %142 : vector<2x32xf32>
    %146 = arith.mulf %137, %102 : vector<2x32xf32>
    %147 = arith.addf %145, %146 : vector<2x32xf32>
    %148 = arith.truncf %147 : vector<2x32xf32> to vector<2x32xbf16>
    %149 = arith.truncf %125 : vector<2x32xf32> to vector<2x32xbf16>
    %150 = tpu.concatenate %148, %149 in 1 : vector<2x32xbf16>, vector<2x32xbf16> -> vector<2x64xbf16>
    %cst_48 = arith.constant dense<0.000000e+00> : vector<2x128xf32>
    %151 = tpu.matmul %150, %3, %cst_48 {dimension_numbers = #tpu.dot_dimension_numbers<[1], [0], [0], [1], [0, 0, 1, 1], [], []>} : vector<2x64xbf16>, vector<64x128xbf16>, vector<2x128xf32> -> vector<2x128xf32>
    %152 = arith.addf %151, %11 : vector<2x128xf32>
    %153 = vector.extract_strided_slice %152 {offsets = [0, 0], sizes = [2, 64], strides = [1, 1]} : vector<2x128xf32> to vector<2x64xf32>
    %154 = arith.negf %153 : vector<2x64xf32>
    %155 = math.exp %154 : vector<2x64xf32>
    %cst_49 = arith.constant 1.000000e+00 : f32
    %156 = vector.broadcast %cst_49 : f32 to vector<2x64xf32>
    %157 = arith.addf %156, %155 : vector<2x64xf32>
    %158 = arith.divf %156, %157 : vector<2x64xf32>
    %159 = vector.extract_strided_slice %158 {offsets = [0, 0], sizes = [2, 32], strides = [1, 1]} : vector<2x64xf32> to vector<2x32xf32>
    %160 = vector.extract_strided_slice %158 {offsets = [0, 32], sizes = [2, 32], strides = [1, 1]} : vector<2x64xf32> to vector<2x32xf32>
    %161 = vector.extract_strided_slice %152 {offsets = [0, 64], sizes = [2, 32], strides = [1, 1]} : vector<2x128xf32> to vector<2x32xf32>
    %162 = vector.extract_strided_slice %152 {offsets = [0, 96], sizes = [2, 32], strides = [1, 1]} : vector<2x128xf32> to vector<2x32xf32>
    %163 = arith.mulf %159, %162 : vector<2x32xf32>
    %164 = arith.addf %161, %163 : vector<2x32xf32>
    %165 = math.tanh %164 : vector<2x32xf32>
    %cst_50 = arith.constant 1.000000e+00 : f32
    %166 = vector.broadcast %cst_50 : f32 to vector<2x32xf32>
    %167 = arith.subf %166, %160 : vector<2x32xf32>
    %168 = arith.mulf %167, %165 : vector<2x32xf32>
    %169 = arith.mulf %160, %125 : vector<2x32xf32>
    %170 = arith.addf %168, %169 : vector<2x32xf32>
    %171 = arith.truncf %147 : vector<2x32xf32> to vector<2x32xbf16>
    %cst_51 = arith.constant dense<0.000000e+00> : vector<2x128xf32>
    %172 = tpu.matmul %171, %27, %cst_51 {dimension_numbers = #tpu.dot_dimension_numbers<[1], [0], [0], [1], [0, 0, 1, 1], [], []>} : vector<2x32xbf16>, vector<32x128xbf16>, vector<2x128xf32> -> vector<2x128xf32>
    %173 = vector.extract_strided_slice %33 {offsets = [6, 0], sizes = [2, 128], strides = [1, 1]} : vector<16x128xf32> to vector<2x128xf32>
    %174 = arith.addf %172, %173 : vector<2x128xf32>
    %175 = vector.extract_strided_slice %174 {offsets = [0, 0], sizes = [2, 64], strides = [1, 1]} : vector<2x128xf32> to vector<2x64xf32>
    %176 = arith.negf %175 : vector<2x64xf32>
    %177 = math.exp %176 : vector<2x64xf32>
    %cst_52 = arith.constant 1.000000e+00 : f32
    %178 = vector.broadcast %cst_52 : f32 to vector<2x64xf32>
    %179 = arith.addf %178, %177 : vector<2x64xf32>
    %180 = arith.divf %178, %179 : vector<2x64xf32>
    %181 = vector.extract_strided_slice %180 {offsets = [0, 0], sizes = [2, 32], strides = [1, 1]} : vector<2x64xf32> to vector<2x32xf32>
    %182 = vector.extract_strided_slice %180 {offsets = [0, 32], sizes = [2, 32], strides = [1, 1]} : vector<2x64xf32> to vector<2x32xf32>
    %183 = vector.extract_strided_slice %174 {offsets = [0, 64], sizes = [2, 32], strides = [1, 1]} : vector<2x128xf32> to vector<2x32xf32>
    %184 = vector.extract_strided_slice %174 {offsets = [0, 96], sizes = [2, 32], strides = [1, 1]} : vector<2x128xf32> to vector<2x32xf32>
    %185 = arith.mulf %181, %184 : vector<2x32xf32>
    %186 = arith.addf %183, %185 : vector<2x32xf32>
    %187 = math.tanh %186 : vector<2x32xf32>
    %cst_53 = arith.constant 1.000000e+00 : f32
    %188 = vector.broadcast %cst_53 : f32 to vector<2x32xf32>
    %189 = arith.subf %188, %182 : vector<2x32xf32>
    %190 = arith.mulf %189, %187 : vector<2x32xf32>
    %191 = arith.mulf %182, %147 : vector<2x32xf32>
    %192 = arith.addf %190, %191 : vector<2x32xf32>
    %193 = arith.truncf %192 : vector<2x32xf32> to vector<2x32xbf16>
    %194 = arith.truncf %170 : vector<2x32xf32> to vector<2x32xbf16>
    %195 = tpu.concatenate %193, %194 in 1 : vector<2x32xbf16>, vector<2x32xbf16> -> vector<2x64xbf16>
    %cst_54 = arith.constant dense<0.000000e+00> : vector<2x128xf32>
    %196 = tpu.matmul %195, %3, %cst_54 {dimension_numbers = #tpu.dot_dimension_numbers<[1], [0], [0], [1], [0, 0, 1, 1], [], []>} : vector<2x64xbf16>, vector<64x128xbf16>, vector<2x128xf32> -> vector<2x128xf32>
    %197 = arith.addf %196, %11 : vector<2x128xf32>
    %198 = vector.extract_strided_slice %197 {offsets = [0, 0], sizes = [2, 64], strides = [1, 1]} : vector<2x128xf32> to vector<2x64xf32>
    %199 = arith.negf %198 : vector<2x64xf32>
    %200 = math.exp %199 : vector<2x64xf32>
    %cst_55 = arith.constant 1.000000e+00 : f32
    %201 = vector.broadcast %cst_55 : f32 to vector<2x64xf32>
    %202 = arith.addf %201, %200 : vector<2x64xf32>
    %203 = arith.divf %201, %202 : vector<2x64xf32>
    %204 = vector.extract_strided_slice %203 {offsets = [0, 0], sizes = [2, 32], strides = [1, 1]} : vector<2x64xf32> to vector<2x32xf32>
    %205 = vector.extract_strided_slice %203 {offsets = [0, 32], sizes = [2, 32], strides = [1, 1]} : vector<2x64xf32> to vector<2x32xf32>
    %206 = vector.extract_strided_slice %197 {offsets = [0, 64], sizes = [2, 32], strides = [1, 1]} : vector<2x128xf32> to vector<2x32xf32>
    %207 = vector.extract_strided_slice %197 {offsets = [0, 96], sizes = [2, 32], strides = [1, 1]} : vector<2x128xf32> to vector<2x32xf32>
    %208 = arith.mulf %204, %207 : vector<2x32xf32>
    %209 = arith.addf %206, %208 : vector<2x32xf32>
    %210 = math.tanh %209 : vector<2x32xf32>
    %cst_56 = arith.constant 1.000000e+00 : f32
    %211 = vector.broadcast %cst_56 : f32 to vector<2x32xf32>
    %212 = arith.subf %211, %205 : vector<2x32xf32>
    %213 = arith.mulf %212, %210 : vector<2x32xf32>
    %214 = arith.mulf %205, %170 : vector<2x32xf32>
    %215 = arith.addf %213, %214 : vector<2x32xf32>
    %216 = arith.truncf %192 : vector<2x32xf32> to vector<2x32xbf16>
    %cst_57 = arith.constant dense<0.000000e+00> : vector<2x128xf32>
    %217 = tpu.matmul %216, %27, %cst_57 {dimension_numbers = #tpu.dot_dimension_numbers<[1], [0], [0], [1], [0, 0, 1, 1], [], []>} : vector<2x32xbf16>, vector<32x128xbf16>, vector<2x128xf32> -> vector<2x128xf32>
    %218 = vector.extract_strided_slice %33 {offsets = [8, 0], sizes = [2, 128], strides = [1, 1]} : vector<16x128xf32> to vector<2x128xf32>
    %219 = arith.addf %217, %218 : vector<2x128xf32>
    %220 = vector.extract_strided_slice %219 {offsets = [0, 0], sizes = [2, 64], strides = [1, 1]} : vector<2x128xf32> to vector<2x64xf32>
    %221 = arith.negf %220 : vector<2x64xf32>
    %222 = math.exp %221 : vector<2x64xf32>
    %cst_58 = arith.constant 1.000000e+00 : f32
    %223 = vector.broadcast %cst_58 : f32 to vector<2x64xf32>
    %224 = arith.addf %223, %222 : vector<2x64xf32>
    %225 = arith.divf %223, %224 : vector<2x64xf32>
    %226 = vector.extract_strided_slice %225 {offsets = [0, 0], sizes = [2, 32], strides = [1, 1]} : vector<2x64xf32> to vector<2x32xf32>
    %227 = vector.extract_strided_slice %225 {offsets = [0, 32], sizes = [2, 32], strides = [1, 1]} : vector<2x64xf32> to vector<2x32xf32>
    %228 = vector.extract_strided_slice %219 {offsets = [0, 64], sizes = [2, 32], strides = [1, 1]} : vector<2x128xf32> to vector<2x32xf32>
    %229 = vector.extract_strided_slice %219 {offsets = [0, 96], sizes = [2, 32], strides = [1, 1]} : vector<2x128xf32> to vector<2x32xf32>
    %230 = arith.mulf %226, %229 : vector<2x32xf32>
    %231 = arith.addf %228, %230 : vector<2x32xf32>
    %232 = math.tanh %231 : vector<2x32xf32>
    %cst_59 = arith.constant 1.000000e+00 : f32
    %233 = vector.broadcast %cst_59 : f32 to vector<2x32xf32>
    %234 = arith.subf %233, %227 : vector<2x32xf32>
    %235 = arith.mulf %234, %232 : vector<2x32xf32>
    %236 = arith.mulf %227, %192 : vector<2x32xf32>
    %237 = arith.addf %235, %236 : vector<2x32xf32>
    %238 = arith.truncf %237 : vector<2x32xf32> to vector<2x32xbf16>
    %239 = arith.truncf %215 : vector<2x32xf32> to vector<2x32xbf16>
    %240 = tpu.concatenate %238, %239 in 1 : vector<2x32xbf16>, vector<2x32xbf16> -> vector<2x64xbf16>
    %cst_60 = arith.constant dense<0.000000e+00> : vector<2x128xf32>
    %241 = tpu.matmul %240, %3, %cst_60 {dimension_numbers = #tpu.dot_dimension_numbers<[1], [0], [0], [1], [0, 0, 1, 1], [], []>} : vector<2x64xbf16>, vector<64x128xbf16>, vector<2x128xf32> -> vector<2x128xf32>
    %242 = arith.addf %241, %11 : vector<2x128xf32>
    %243 = vector.extract_strided_slice %242 {offsets = [0, 0], sizes = [2, 64], strides = [1, 1]} : vector<2x128xf32> to vector<2x64xf32>
    %244 = arith.negf %243 : vector<2x64xf32>
    %245 = math.exp %244 : vector<2x64xf32>
    %cst_61 = arith.constant 1.000000e+00 : f32
    %246 = vector.broadcast %cst_61 : f32 to vector<2x64xf32>
    %247 = arith.addf %246, %245 : vector<2x64xf32>
    %248 = arith.divf %246, %247 : vector<2x64xf32>
    %249 = vector.extract_strided_slice %248 {offsets = [0, 0], sizes = [2, 32], strides = [1, 1]} : vector<2x64xf32> to vector<2x32xf32>
    %250 = vector.extract_strided_slice %248 {offsets = [0, 32], sizes = [2, 32], strides = [1, 1]} : vector<2x64xf32> to vector<2x32xf32>
    %251 = vector.extract_strided_slice %242 {offsets = [0, 64], sizes = [2, 32], strides = [1, 1]} : vector<2x128xf32> to vector<2x32xf32>
    %252 = vector.extract_strided_slice %242 {offsets = [0, 96], sizes = [2, 32], strides = [1, 1]} : vector<2x128xf32> to vector<2x32xf32>
    %253 = arith.mulf %249, %252 : vector<2x32xf32>
    %254 = arith.addf %251, %253 : vector<2x32xf32>
    %255 = math.tanh %254 : vector<2x32xf32>
    %cst_62 = arith.constant 1.000000e+00 : f32
    %256 = vector.broadcast %cst_62 : f32 to vector<2x32xf32>
    %257 = arith.subf %256, %250 : vector<2x32xf32>
    %258 = arith.mulf %257, %255 : vector<2x32xf32>
    %259 = arith.mulf %250, %215 : vector<2x32xf32>
    %260 = arith.addf %258, %259 : vector<2x32xf32>
    %261 = arith.truncf %237 : vector<2x32xf32> to vector<2x32xbf16>
    %cst_63 = arith.constant dense<0.000000e+00> : vector<2x128xf32>
    %262 = tpu.matmul %261, %27, %cst_63 {dimension_numbers = #tpu.dot_dimension_numbers<[1], [0], [0], [1], [0, 0, 1, 1], [], []>} : vector<2x32xbf16>, vector<32x128xbf16>, vector<2x128xf32> -> vector<2x128xf32>
    %263 = vector.extract_strided_slice %33 {offsets = [10, 0], sizes = [2, 128], strides = [1, 1]} : vector<16x128xf32> to vector<2x128xf32>
    %264 = arith.addf %262, %263 : vector<2x128xf32>
    %265 = vector.extract_strided_slice %264 {offsets = [0, 0], sizes = [2, 64], strides = [1, 1]} : vector<2x128xf32> to vector<2x64xf32>
    %266 = arith.negf %265 : vector<2x64xf32>
    %267 = math.exp %266 : vector<2x64xf32>
    %cst_64 = arith.constant 1.000000e+00 : f32
    %268 = vector.broadcast %cst_64 : f32 to vector<2x64xf32>
    %269 = arith.addf %268, %267 : vector<2x64xf32>
    %270 = arith.divf %268, %269 : vector<2x64xf32>
    %271 = vector.extract_strided_slice %270 {offsets = [0, 0], sizes = [2, 32], strides = [1, 1]} : vector<2x64xf32> to vector<2x32xf32>
    %272 = vector.extract_strided_slice %270 {offsets = [0, 32], sizes = [2, 32], strides = [1, 1]} : vector<2x64xf32> to vector<2x32xf32>
    %273 = vector.extract_strided_slice %264 {offsets = [0, 64], sizes = [2, 32], strides = [1, 1]} : vector<2x128xf32> to vector<2x32xf32>
    %274 = vector.extract_strided_slice %264 {offsets = [0, 96], sizes = [2, 32], strides = [1, 1]} : vector<2x128xf32> to vector<2x32xf32>
    %275 = arith.mulf %271, %274 : vector<2x32xf32>
    %276 = arith.addf %273, %275 : vector<2x32xf32>
    %277 = math.tanh %276 : vector<2x32xf32>
    %cst_65 = arith.constant 1.000000e+00 : f32
    %278 = vector.broadcast %cst_65 : f32 to vector<2x32xf32>
    %279 = arith.subf %278, %272 : vector<2x32xf32>
    %280 = arith.mulf %279, %277 : vector<2x32xf32>
    %281 = arith.mulf %272, %237 : vector<2x32xf32>
    %282 = arith.addf %280, %281 : vector<2x32xf32>
    %283 = arith.truncf %282 : vector<2x32xf32> to vector<2x32xbf16>
    %284 = arith.truncf %260 : vector<2x32xf32> to vector<2x32xbf16>
    %285 = tpu.concatenate %283, %284 in 1 : vector<2x32xbf16>, vector<2x32xbf16> -> vector<2x64xbf16>
    %cst_66 = arith.constant dense<0.000000e+00> : vector<2x128xf32>
    %286 = tpu.matmul %285, %3, %cst_66 {dimension_numbers = #tpu.dot_dimension_numbers<[1], [0], [0], [1], [0, 0, 1, 1], [], []>} : vector<2x64xbf16>, vector<64x128xbf16>, vector<2x128xf32> -> vector<2x128xf32>
    %287 = arith.addf %286, %11 : vector<2x128xf32>
    %288 = vector.extract_strided_slice %287 {offsets = [0, 0], sizes = [2, 64], strides = [1, 1]} : vector<2x128xf32> to vector<2x64xf32>
    %289 = arith.negf %288 : vector<2x64xf32>
    %290 = math.exp %289 : vector<2x64xf32>
    %cst_67 = arith.constant 1.000000e+00 : f32
    %291 = vector.broadcast %cst_67 : f32 to vector<2x64xf32>
    %292 = arith.addf %291, %290 : vector<2x64xf32>
    %293 = arith.divf %291, %292 : vector<2x64xf32>
    %294 = vector.extract_strided_slice %293 {offsets = [0, 0], sizes = [2, 32], strides = [1, 1]} : vector<2x64xf32> to vector<2x32xf32>
    %295 = vector.extract_strided_slice %293 {offsets = [0, 32], sizes = [2, 32], strides = [1, 1]} : vector<2x64xf32> to vector<2x32xf32>
    %296 = vector.extract_strided_slice %287 {offsets = [0, 64], sizes = [2, 32], strides = [1, 1]} : vector<2x128xf32> to vector<2x32xf32>
    %297 = vector.extract_strided_slice %287 {offsets = [0, 96], sizes = [2, 32], strides = [1, 1]} : vector<2x128xf32> to vector<2x32xf32>
    %298 = arith.mulf %294, %297 : vector<2x32xf32>
    %299 = arith.addf %296, %298 : vector<2x32xf32>
    %300 = math.tanh %299 : vector<2x32xf32>
    %cst_68 = arith.constant 1.000000e+00 : f32
    %301 = vector.broadcast %cst_68 : f32 to vector<2x32xf32>
    %302 = arith.subf %301, %295 : vector<2x32xf32>
    %303 = arith.mulf %302, %300 : vector<2x32xf32>
    %304 = arith.mulf %295, %260 : vector<2x32xf32>
    %305 = arith.addf %303, %304 : vector<2x32xf32>
    %306 = arith.truncf %282 : vector<2x32xf32> to vector<2x32xbf16>
    %cst_69 = arith.constant dense<0.000000e+00> : vector<2x128xf32>
    %307 = tpu.matmul %306, %27, %cst_69 {dimension_numbers = #tpu.dot_dimension_numbers<[1], [0], [0], [1], [0, 0, 1, 1], [], []>} : vector<2x32xbf16>, vector<32x128xbf16>, vector<2x128xf32> -> vector<2x128xf32>
    %308 = vector.extract_strided_slice %33 {offsets = [12, 0], sizes = [2, 128], strides = [1, 1]} : vector<16x128xf32> to vector<2x128xf32>
    %309 = arith.addf %307, %308 : vector<2x128xf32>
    %310 = vector.extract_strided_slice %309 {offsets = [0, 0], sizes = [2, 64], strides = [1, 1]} : vector<2x128xf32> to vector<2x64xf32>
    %311 = arith.negf %310 : vector<2x64xf32>
    %312 = math.exp %311 : vector<2x64xf32>
    %cst_70 = arith.constant 1.000000e+00 : f32
    %313 = vector.broadcast %cst_70 : f32 to vector<2x64xf32>
    %314 = arith.addf %313, %312 : vector<2x64xf32>
    %315 = arith.divf %313, %314 : vector<2x64xf32>
    %316 = vector.extract_strided_slice %315 {offsets = [0, 0], sizes = [2, 32], strides = [1, 1]} : vector<2x64xf32> to vector<2x32xf32>
    %317 = vector.extract_strided_slice %315 {offsets = [0, 32], sizes = [2, 32], strides = [1, 1]} : vector<2x64xf32> to vector<2x32xf32>
    %318 = vector.extract_strided_slice %309 {offsets = [0, 64], sizes = [2, 32], strides = [1, 1]} : vector<2x128xf32> to vector<2x32xf32>
    %319 = vector.extract_strided_slice %309 {offsets = [0, 96], sizes = [2, 32], strides = [1, 1]} : vector<2x128xf32> to vector<2x32xf32>
    %320 = arith.mulf %316, %319 : vector<2x32xf32>
    %321 = arith.addf %318, %320 : vector<2x32xf32>
    %322 = math.tanh %321 : vector<2x32xf32>
    %cst_71 = arith.constant 1.000000e+00 : f32
    %323 = vector.broadcast %cst_71 : f32 to vector<2x32xf32>
    %324 = arith.subf %323, %317 : vector<2x32xf32>
    %325 = arith.mulf %324, %322 : vector<2x32xf32>
    %326 = arith.mulf %317, %282 : vector<2x32xf32>
    %327 = arith.addf %325, %326 : vector<2x32xf32>
    %328 = arith.truncf %327 : vector<2x32xf32> to vector<2x32xbf16>
    %329 = arith.truncf %305 : vector<2x32xf32> to vector<2x32xbf16>
    %330 = tpu.concatenate %328, %329 in 1 : vector<2x32xbf16>, vector<2x32xbf16> -> vector<2x64xbf16>
    %cst_72 = arith.constant dense<0.000000e+00> : vector<2x128xf32>
    %331 = tpu.matmul %330, %3, %cst_72 {dimension_numbers = #tpu.dot_dimension_numbers<[1], [0], [0], [1], [0, 0, 1, 1], [], []>} : vector<2x64xbf16>, vector<64x128xbf16>, vector<2x128xf32> -> vector<2x128xf32>
    %332 = arith.addf %331, %11 : vector<2x128xf32>
    %333 = vector.extract_strided_slice %332 {offsets = [0, 0], sizes = [2, 64], strides = [1, 1]} : vector<2x128xf32> to vector<2x64xf32>
    %334 = arith.negf %333 : vector<2x64xf32>
    %335 = math.exp %334 : vector<2x64xf32>
    %cst_73 = arith.constant 1.000000e+00 : f32
    %336 = vector.broadcast %cst_73 : f32 to vector<2x64xf32>
    %337 = arith.addf %336, %335 : vector<2x64xf32>
    %338 = arith.divf %336, %337 : vector<2x64xf32>
    %339 = vector.extract_strided_slice %338 {offsets = [0, 0], sizes = [2, 32], strides = [1, 1]} : vector<2x64xf32> to vector<2x32xf32>
    %340 = vector.extract_strided_slice %338 {offsets = [0, 32], sizes = [2, 32], strides = [1, 1]} : vector<2x64xf32> to vector<2x32xf32>
    %341 = vector.extract_strided_slice %332 {offsets = [0, 64], sizes = [2, 32], strides = [1, 1]} : vector<2x128xf32> to vector<2x32xf32>
    %342 = vector.extract_strided_slice %332 {offsets = [0, 96], sizes = [2, 32], strides = [1, 1]} : vector<2x128xf32> to vector<2x32xf32>
    %343 = arith.mulf %339, %342 : vector<2x32xf32>
    %344 = arith.addf %341, %343 : vector<2x32xf32>
    %345 = math.tanh %344 : vector<2x32xf32>
    %cst_74 = arith.constant 1.000000e+00 : f32
    %346 = vector.broadcast %cst_74 : f32 to vector<2x32xf32>
    %347 = arith.subf %346, %340 : vector<2x32xf32>
    %348 = arith.mulf %347, %345 : vector<2x32xf32>
    %349 = arith.mulf %340, %305 : vector<2x32xf32>
    %350 = arith.addf %348, %349 : vector<2x32xf32>
    %351 = arith.truncf %327 : vector<2x32xf32> to vector<2x32xbf16>
    %cst_75 = arith.constant dense<0.000000e+00> : vector<2x128xf32>
    %352 = tpu.matmul %351, %27, %cst_75 {dimension_numbers = #tpu.dot_dimension_numbers<[1], [0], [0], [1], [0, 0, 1, 1], [], []>} : vector<2x32xbf16>, vector<32x128xbf16>, vector<2x128xf32> -> vector<2x128xf32>
    %353 = vector.extract_strided_slice %33 {offsets = [14, 0], sizes = [2, 128], strides = [1, 1]} : vector<16x128xf32> to vector<2x128xf32>
    %354 = arith.addf %352, %353 : vector<2x128xf32>
    %355 = vector.extract_strided_slice %354 {offsets = [0, 0], sizes = [2, 64], strides = [1, 1]} : vector<2x128xf32> to vector<2x64xf32>
    %356 = arith.negf %355 : vector<2x64xf32>
    %357 = math.exp %356 : vector<2x64xf32>
    %cst_76 = arith.constant 1.000000e+00 : f32
    %358 = vector.broadcast %cst_76 : f32 to vector<2x64xf32>
    %359 = arith.addf %358, %357 : vector<2x64xf32>
    %360 = arith.divf %358, %359 : vector<2x64xf32>
    %361 = vector.extract_strided_slice %360 {offsets = [0, 0], sizes = [2, 32], strides = [1, 1]} : vector<2x64xf32> to vector<2x32xf32>
    %362 = vector.extract_strided_slice %360 {offsets = [0, 32], sizes = [2, 32], strides = [1, 1]} : vector<2x64xf32> to vector<2x32xf32>
    %363 = vector.extract_strided_slice %354 {offsets = [0, 64], sizes = [2, 32], strides = [1, 1]} : vector<2x128xf32> to vector<2x32xf32>
    %364 = vector.extract_strided_slice %354 {offsets = [0, 96], sizes = [2, 32], strides = [1, 1]} : vector<2x128xf32> to vector<2x32xf32>
    %365 = arith.mulf %361, %364 : vector<2x32xf32>
    %366 = arith.addf %363, %365 : vector<2x32xf32>
    %367 = math.tanh %366 : vector<2x32xf32>
    %cst_77 = arith.constant 1.000000e+00 : f32
    %368 = vector.broadcast %cst_77 : f32 to vector<2x32xf32>
    %369 = arith.subf %368, %362 : vector<2x32xf32>
    %370 = arith.mulf %369, %367 : vector<2x32xf32>
    %371 = arith.mulf %362, %327 : vector<2x32xf32>
    %372 = arith.addf %370, %371 : vector<2x32xf32>
    %373 = arith.truncf %372 : vector<2x32xf32> to vector<2x32xbf16>
    %374 = arith.truncf %350 : vector<2x32xf32> to vector<2x32xbf16>
    %375 = tpu.concatenate %373, %374 in 1 : vector<2x32xbf16>, vector<2x32xbf16> -> vector<2x64xbf16>
    %cst_78 = arith.constant dense<0.000000e+00> : vector<2x128xf32>
    %376 = tpu.matmul %375, %3, %cst_78 {dimension_numbers = #tpu.dot_dimension_numbers<[1], [0], [0], [1], [0, 0, 1, 1], [], []>} : vector<2x64xbf16>, vector<64x128xbf16>, vector<2x128xf32> -> vector<2x128xf32>
    %377 = arith.addf %376, %11 : vector<2x128xf32>
    %378 = vector.extract_strided_slice %377 {offsets = [0, 0], sizes = [2, 64], strides = [1, 1]} : vector<2x128xf32> to vector<2x64xf32>
    %379 = arith.negf %378 : vector<2x64xf32>
    %380 = math.exp %379 : vector<2x64xf32>
    %cst_79 = arith.constant 1.000000e+00 : f32
    %381 = vector.broadcast %cst_79 : f32 to vector<2x64xf32>
    %382 = arith.addf %381, %380 : vector<2x64xf32>
    %383 = arith.divf %381, %382 : vector<2x64xf32>
    %384 = vector.extract_strided_slice %383 {offsets = [0, 0], sizes = [2, 32], strides = [1, 1]} : vector<2x64xf32> to vector<2x32xf32>
    %385 = vector.extract_strided_slice %383 {offsets = [0, 32], sizes = [2, 32], strides = [1, 1]} : vector<2x64xf32> to vector<2x32xf32>
    %386 = vector.extract_strided_slice %377 {offsets = [0, 64], sizes = [2, 32], strides = [1, 1]} : vector<2x128xf32> to vector<2x32xf32>
    %387 = vector.extract_strided_slice %377 {offsets = [0, 96], sizes = [2, 32], strides = [1, 1]} : vector<2x128xf32> to vector<2x32xf32>
    %388 = arith.mulf %384, %387 : vector<2x32xf32>
    %389 = arith.addf %386, %388 : vector<2x32xf32>
    %390 = math.tanh %389 : vector<2x32xf32>
    %cst_80 = arith.constant 1.000000e+00 : f32
    %391 = vector.broadcast %cst_80 : f32 to vector<2x32xf32>
    %392 = arith.subf %391, %385 : vector<2x32xf32>
    %393 = arith.mulf %392, %390 : vector<2x32xf32>
    %394 = arith.mulf %385, %350 : vector<2x32xf32>
    %395 = arith.addf %393, %394 : vector<2x32xf32>
    %396 = vector.extract_strided_slice %24 {offsets = [14, 0], sizes = [2, 32], strides = [1, 1]} : vector<16x32xbf16> to vector<2x32xbf16>
    %397 = arith.truncf %372 : vector<2x32xf32> to vector<2x32xbf16>
    %398 = tpu.concatenate %396, %397 in 1 : vector<2x32xbf16>, vector<2x32xbf16> -> vector<2x64xbf16>
    %cst_81 = arith.constant dense<0.000000e+00> : vector<2x128xf32>
    %399 = tpu.matmul %398, %5, %cst_81 {dimension_numbers = #tpu.dot_dimension_numbers<[1], [0], [0], [1], [0, 0, 1, 1], [], []>} : vector<2x64xbf16>, vector<64x128xbf16>, vector<2x128xf32> -> vector<2x128xf32>
    %400 = arith.addf %399, %15 : vector<2x128xf32>
    %401 = vector.extract_strided_slice %400 {offsets = [0, 0], sizes = [2, 64], strides = [1, 1]} : vector<2x128xf32> to vector<2x64xf32>
    %402 = arith.negf %401 : vector<2x64xf32>
    %403 = math.exp %402 : vector<2x64xf32>
    %cst_82 = arith.constant 1.000000e+00 : f32
    %404 = vector.broadcast %cst_82 : f32 to vector<2x64xf32>
    %405 = arith.addf %404, %403 : vector<2x64xf32>
    %406 = arith.divf %404, %405 : vector<2x64xf32>
    %407 = vector.extract_strided_slice %406 {offsets = [0, 0], sizes = [2, 32], strides = [1, 1]} : vector<2x64xf32> to vector<2x32xf32>
    %408 = vector.extract_strided_slice %406 {offsets = [0, 32], sizes = [2, 32], strides = [1, 1]} : vector<2x64xf32> to vector<2x32xf32>
    %409 = vector.extract_strided_slice %400 {offsets = [0, 64], sizes = [2, 32], strides = [1, 1]} : vector<2x128xf32> to vector<2x32xf32>
    %410 = vector.extract_strided_slice %400 {offsets = [0, 96], sizes = [2, 32], strides = [1, 1]} : vector<2x128xf32> to vector<2x32xf32>
    %411 = arith.mulf %407, %410 : vector<2x32xf32>
    %412 = arith.addf %409, %411 : vector<2x32xf32>
    %413 = math.tanh %412 : vector<2x32xf32>
    %cst_83 = arith.constant 1.000000e+00 : f32
    %414 = vector.broadcast %cst_83 : f32 to vector<2x32xf32>
    %415 = arith.subf %414, %408 : vector<2x32xf32>
    %416 = arith.mulf %415, %413 : vector<2x32xf32>
    %417 = arith.mulf %408, %372 : vector<2x32xf32>
    %418 = arith.addf %416, %417 : vector<2x32xf32>
    %419 = arith.truncf %418 : vector<2x32xf32> to vector<2x32xbf16>
    %420 = arith.truncf %395 : vector<2x32xf32> to vector<2x32xbf16>
    %421 = tpu.concatenate %419, %420 in 1 : vector<2x32xbf16>, vector<2x32xbf16> -> vector<2x64xbf16>
    %cst_84 = arith.constant dense<0.000000e+00> : vector<2x128xf32>
    %422 = tpu.matmul %421, %7, %cst_84 {dimension_numbers = #tpu.dot_dimension_numbers<[1], [0], [0], [1], [0, 0, 1, 1], [], []>} : vector<2x64xbf16>, vector<64x128xbf16>, vector<2x128xf32> -> vector<2x128xf32>
    %423 = arith.addf %422, %19 : vector<2x128xf32>
    %424 = vector.extract_strided_slice %423 {offsets = [0, 0], sizes = [2, 64], strides = [1, 1]} : vector<2x128xf32> to vector<2x64xf32>
    %425 = arith.negf %424 : vector<2x64xf32>
    %426 = math.exp %425 : vector<2x64xf32>
    %cst_85 = arith.constant 1.000000e+00 : f32
    %427 = vector.broadcast %cst_85 : f32 to vector<2x64xf32>
    %428 = arith.addf %427, %426 : vector<2x64xf32>
    %429 = arith.divf %427, %428 : vector<2x64xf32>
    %430 = vector.extract_strided_slice %429 {offsets = [0, 0], sizes = [2, 32], strides = [1, 1]} : vector<2x64xf32> to vector<2x32xf32>
    %431 = vector.extract_strided_slice %429 {offsets = [0, 32], sizes = [2, 32], strides = [1, 1]} : vector<2x64xf32> to vector<2x32xf32>
    %432 = vector.extract_strided_slice %423 {offsets = [0, 64], sizes = [2, 32], strides = [1, 1]} : vector<2x128xf32> to vector<2x32xf32>
    %433 = vector.extract_strided_slice %423 {offsets = [0, 96], sizes = [2, 32], strides = [1, 1]} : vector<2x128xf32> to vector<2x32xf32>
    %434 = arith.mulf %430, %433 : vector<2x32xf32>
    %435 = arith.addf %432, %434 : vector<2x32xf32>
    %436 = math.tanh %435 : vector<2x32xf32>
    %cst_86 = arith.constant 1.000000e+00 : f32
    %437 = vector.broadcast %cst_86 : f32 to vector<2x32xf32>
    %438 = arith.subf %437, %431 : vector<2x32xf32>
    %439 = arith.mulf %438, %436 : vector<2x32xf32>
    %440 = arith.mulf %431, %395 : vector<2x32xf32>
    %441 = arith.addf %439, %440 : vector<2x32xf32>
    %442 = arith.truncf %441 : vector<2x32xf32> to vector<2x32xbf16>
    %cst_87 = arith.constant dense<0.000000e+00> : vector<2x32xf32>
    %443 = tpu.matmul %442, %20, %cst_87 {dimension_numbers = #tpu.dot_dimension_numbers<[1], [0], [0], [1], [0, 0, 1, 1], [], []>} : vector<2x32xbf16>, vector<32x32xbf16>, vector<2x32xf32> -> vector<2x32xf32>
    %444 = arith.addf %443, %23 : vector<2x32xf32>
    %445 = vector.extract_strided_slice %444 {offsets = [0, 0], sizes = [2, 1], strides = [1, 1]} : vector<2x32xf32> to vector<2x1xf32>
    %c0_88 = arith.constant 0 : index
    %446 = memref.load %arg0[%c0_88] : memref<4xi32, #tpu.memory_space<smem>>
    %c1_i32 = arith.constant 1 : i32
    %447 = arith.cmpi eq, %446, %c1_i32 : i32
    %448 = vector.extract_strided_slice %25 {offsets = [0, 0, 0], sizes = [1, 2, 32], strides = [1, 1, 1]} : vector<4x2x32xbf16> to vector<1x2x32xbf16>
    %449 = vector.shape_cast %448 : vector<1x2x32xbf16> to vector<2x32xbf16>
    %450 = arith.truncf %444 : vector<2x32xf32> to vector<2x32xbf16>
    %451 = arith.select %447, %449, %450 : vector<2x32xbf16>
    %452 = arith.truncf %418 : vector<2x32xf32> to vector<2x32xbf16>
    %453 = tpu.concatenate %451, %452 in 1 : vector<2x32xbf16>, vector<2x32xbf16> -> vector<2x64xbf16>
    %cst_89 = arith.constant dense<0.000000e+00> : vector<2x128xf32>
    %454 = tpu.matmul %453, %5, %cst_89 {dimension_numbers = #tpu.dot_dimension_numbers<[1], [0], [0], [1], [0, 0, 1, 1], [], []>} : vector<2x64xbf16>, vector<64x128xbf16>, vector<2x128xf32> -> vector<2x128xf32>
    %455 = arith.addf %454, %15 : vector<2x128xf32>
    %456 = vector.extract_strided_slice %455 {offsets = [0, 0], sizes = [2, 64], strides = [1, 1]} : vector<2x128xf32> to vector<2x64xf32>
    %457 = arith.negf %456 : vector<2x64xf32>
    %458 = math.exp %457 : vector<2x64xf32>
    %cst_90 = arith.constant 1.000000e+00 : f32
    %459 = vector.broadcast %cst_90 : f32 to vector<2x64xf32>
    %460 = arith.addf %459, %458 : vector<2x64xf32>
    %461 = arith.divf %459, %460 : vector<2x64xf32>
    %462 = vector.extract_strided_slice %461 {offsets = [0, 0], sizes = [2, 32], strides = [1, 1]} : vector<2x64xf32> to vector<2x32xf32>
    %463 = vector.extract_strided_slice %461 {offsets = [0, 32], sizes = [2, 32], strides = [1, 1]} : vector<2x64xf32> to vector<2x32xf32>
    %464 = vector.extract_strided_slice %455 {offsets = [0, 64], sizes = [2, 32], strides = [1, 1]} : vector<2x128xf32> to vector<2x32xf32>
    %465 = vector.extract_strided_slice %455 {offsets = [0, 96], sizes = [2, 32], strides = [1, 1]} : vector<2x128xf32> to vector<2x32xf32>
    %466 = arith.mulf %462, %465 : vector<2x32xf32>
    %467 = arith.addf %464, %466 : vector<2x32xf32>
    %468 = math.tanh %467 : vector<2x32xf32>
    %cst_91 = arith.constant 1.000000e+00 : f32
    %469 = vector.broadcast %cst_91 : f32 to vector<2x32xf32>
    %470 = arith.subf %469, %463 : vector<2x32xf32>
    %471 = arith.mulf %470, %468 : vector<2x32xf32>
    %472 = arith.mulf %463, %418 : vector<2x32xf32>
    %473 = arith.addf %471, %472 : vector<2x32xf32>
    %474 = arith.truncf %473 : vector<2x32xf32> to vector<2x32xbf16>
    %475 = arith.truncf %441 : vector<2x32xf32> to vector<2x32xbf16>
    %476 = tpu.concatenate %474, %475 in 1 : vector<2x32xbf16>, vector<2x32xbf16> -> vector<2x64xbf16>
    %cst_92 = arith.constant dense<0.000000e+00> : vector<2x128xf32>
    %477 = tpu.matmul %476, %7, %cst_92 {dimension_numbers = #tpu.dot_dimension_numbers<[1], [0], [0], [1], [0, 0, 1, 1], [], []>} : vector<2x64xbf16>, vector<64x128xbf16>, vector<2x128xf32> -> vector<2x128xf32>
    %478 = arith.addf %477, %19 : vector<2x128xf32>
    %479 = vector.extract_strided_slice %478 {offsets = [0, 0], sizes = [2, 64], strides = [1, 1]} : vector<2x128xf32> to vector<2x64xf32>
    %480 = arith.negf %479 : vector<2x64xf32>
    %481 = math.exp %480 : vector<2x64xf32>
    %cst_93 = arith.constant 1.000000e+00 : f32
    %482 = vector.broadcast %cst_93 : f32 to vector<2x64xf32>
    %483 = arith.addf %482, %481 : vector<2x64xf32>
    %484 = arith.divf %482, %483 : vector<2x64xf32>
    %485 = vector.extract_strided_slice %484 {offsets = [0, 0], sizes = [2, 32], strides = [1, 1]} : vector<2x64xf32> to vector<2x32xf32>
    %486 = vector.extract_strided_slice %484 {offsets = [0, 32], sizes = [2, 32], strides = [1, 1]} : vector<2x64xf32> to vector<2x32xf32>
    %487 = vector.extract_strided_slice %478 {offsets = [0, 64], sizes = [2, 32], strides = [1, 1]} : vector<2x128xf32> to vector<2x32xf32>
    %488 = vector.extract_strided_slice %478 {offsets = [0, 96], sizes = [2, 32], strides = [1, 1]} : vector<2x128xf32> to vector<2x32xf32>
    %489 = arith.mulf %485, %488 : vector<2x32xf32>
    %490 = arith.addf %487, %489 : vector<2x32xf32>
    %491 = math.tanh %490 : vector<2x32xf32>
    %cst_94 = arith.constant 1.000000e+00 : f32
    %492 = vector.broadcast %cst_94 : f32 to vector<2x32xf32>
    %493 = arith.subf %492, %486 : vector<2x32xf32>
    %494 = arith.mulf %493, %491 : vector<2x32xf32>
    %495 = arith.mulf %486, %441 : vector<2x32xf32>
    %496 = arith.addf %494, %495 : vector<2x32xf32>
    %497 = arith.truncf %496 : vector<2x32xf32> to vector<2x32xbf16>
    %cst_95 = arith.constant dense<0.000000e+00> : vector<2x32xf32>
    %498 = tpu.matmul %497, %20, %cst_95 {dimension_numbers = #tpu.dot_dimension_numbers<[1], [0], [0], [1], [0, 0, 1, 1], [], []>} : vector<2x32xbf16>, vector<32x32xbf16>, vector<2x32xf32> -> vector<2x32xf32>
    %499 = arith.addf %498, %23 : vector<2x32xf32>
    %500 = vector.extract_strided_slice %499 {offsets = [0, 0], sizes = [2, 1], strides = [1, 1]} : vector<2x32xf32> to vector<2x1xf32>
    %c1_96 = arith.constant 1 : index
    %501 = memref.load %arg0[%c1_96] : memref<4xi32, #tpu.memory_space<smem>>
    %c1_i32_97 = arith.constant 1 : i32
    %502 = arith.cmpi eq, %501, %c1_i32_97 : i32
    %503 = vector.extract_strided_slice %25 {offsets = [1, 0, 0], sizes = [1, 2, 32], strides = [1, 1, 1]} : vector<4x2x32xbf16> to vector<1x2x32xbf16>
    %504 = vector.shape_cast %503 : vector<1x2x32xbf16> to vector<2x32xbf16>
    %505 = arith.truncf %499 : vector<2x32xf32> to vector<2x32xbf16>
    %506 = arith.select %502, %504, %505 : vector<2x32xbf16>
    %507 = arith.truncf %473 : vector<2x32xf32> to vector<2x32xbf16>
    %508 = tpu.concatenate %506, %507 in 1 : vector<2x32xbf16>, vector<2x32xbf16> -> vector<2x64xbf16>
    %cst_98 = arith.constant dense<0.000000e+00> : vector<2x128xf32>
    %509 = tpu.matmul %508, %5, %cst_98 {dimension_numbers = #tpu.dot_dimension_numbers<[1], [0], [0], [1], [0, 0, 1, 1], [], []>} : vector<2x64xbf16>, vector<64x128xbf16>, vector<2x128xf32> -> vector<2x128xf32>
    %510 = arith.addf %509, %15 : vector<2x128xf32>
    %511 = vector.extract_strided_slice %510 {offsets = [0, 0], sizes = [2, 64], strides = [1, 1]} : vector<2x128xf32> to vector<2x64xf32>
    %512 = arith.negf %511 : vector<2x64xf32>
    %513 = math.exp %512 : vector<2x64xf32>
    %cst_99 = arith.constant 1.000000e+00 : f32
    %514 = vector.broadcast %cst_99 : f32 to vector<2x64xf32>
    %515 = arith.addf %514, %513 : vector<2x64xf32>
    %516 = arith.divf %514, %515 : vector<2x64xf32>
    %517 = vector.extract_strided_slice %516 {offsets = [0, 0], sizes = [2, 32], strides = [1, 1]} : vector<2x64xf32> to vector<2x32xf32>
    %518 = vector.extract_strided_slice %516 {offsets = [0, 32], sizes = [2, 32], strides = [1, 1]} : vector<2x64xf32> to vector<2x32xf32>
    %519 = vector.extract_strided_slice %510 {offsets = [0, 64], sizes = [2, 32], strides = [1, 1]} : vector<2x128xf32> to vector<2x32xf32>
    %520 = vector.extract_strided_slice %510 {offsets = [0, 96], sizes = [2, 32], strides = [1, 1]} : vector<2x128xf32> to vector<2x32xf32>
    %521 = arith.mulf %517, %520 : vector<2x32xf32>
    %522 = arith.addf %519, %521 : vector<2x32xf32>
    %523 = math.tanh %522 : vector<2x32xf32>
    %cst_100 = arith.constant 1.000000e+00 : f32
    %524 = vector.broadcast %cst_100 : f32 to vector<2x32xf32>
    %525 = arith.subf %524, %518 : vector<2x32xf32>
    %526 = arith.mulf %525, %523 : vector<2x32xf32>
    %527 = arith.mulf %518, %473 : vector<2x32xf32>
    %528 = arith.addf %526, %527 : vector<2x32xf32>
    %529 = arith.truncf %528 : vector<2x32xf32> to vector<2x32xbf16>
    %530 = arith.truncf %496 : vector<2x32xf32> to vector<2x32xbf16>
    %531 = tpu.concatenate %529, %530 in 1 : vector<2x32xbf16>, vector<2x32xbf16> -> vector<2x64xbf16>
    %cst_101 = arith.constant dense<0.000000e+00> : vector<2x128xf32>
    %532 = tpu.matmul %531, %7, %cst_101 {dimension_numbers = #tpu.dot_dimension_numbers<[1], [0], [0], [1], [0, 0, 1, 1], [], []>} : vector<2x64xbf16>, vector<64x128xbf16>, vector<2x128xf32> -> vector<2x128xf32>
    %533 = arith.addf %532, %19 : vector<2x128xf32>
    %534 = vector.extract_strided_slice %533 {offsets = [0, 0], sizes = [2, 64], strides = [1, 1]} : vector<2x128xf32> to vector<2x64xf32>
    %535 = arith.negf %534 : vector<2x64xf32>
    %536 = math.exp %535 : vector<2x64xf32>
    %cst_102 = arith.constant 1.000000e+00 : f32
    %537 = vector.broadcast %cst_102 : f32 to vector<2x64xf32>
    %538 = arith.addf %537, %536 : vector<2x64xf32>
    %539 = arith.divf %537, %538 : vector<2x64xf32>
    %540 = vector.extract_strided_slice %539 {offsets = [0, 0], sizes = [2, 32], strides = [1, 1]} : vector<2x64xf32> to vector<2x32xf32>
    %541 = vector.extract_strided_slice %539 {offsets = [0, 32], sizes = [2, 32], strides = [1, 1]} : vector<2x64xf32> to vector<2x32xf32>
    %542 = vector.extract_strided_slice %533 {offsets = [0, 64], sizes = [2, 32], strides = [1, 1]} : vector<2x128xf32> to vector<2x32xf32>
    %543 = vector.extract_strided_slice %533 {offsets = [0, 96], sizes = [2, 32], strides = [1, 1]} : vector<2x128xf32> to vector<2x32xf32>
    %544 = arith.mulf %540, %543 : vector<2x32xf32>
    %545 = arith.addf %542, %544 : vector<2x32xf32>
    %546 = math.tanh %545 : vector<2x32xf32>
    %cst_103 = arith.constant 1.000000e+00 : f32
    %547 = vector.broadcast %cst_103 : f32 to vector<2x32xf32>
    %548 = arith.subf %547, %541 : vector<2x32xf32>
    %549 = arith.mulf %548, %546 : vector<2x32xf32>
    %550 = arith.mulf %541, %496 : vector<2x32xf32>
    %551 = arith.addf %549, %550 : vector<2x32xf32>
    %552 = arith.truncf %551 : vector<2x32xf32> to vector<2x32xbf16>
    %cst_104 = arith.constant dense<0.000000e+00> : vector<2x32xf32>
    %553 = tpu.matmul %552, %20, %cst_104 {dimension_numbers = #tpu.dot_dimension_numbers<[1], [0], [0], [1], [0, 0, 1, 1], [], []>} : vector<2x32xbf16>, vector<32x32xbf16>, vector<2x32xf32> -> vector<2x32xf32>
    %554 = arith.addf %553, %23 : vector<2x32xf32>
    %555 = vector.extract_strided_slice %554 {offsets = [0, 0], sizes = [2, 1], strides = [1, 1]} : vector<2x32xf32> to vector<2x1xf32>
    %c2 = arith.constant 2 : index
    %556 = memref.load %arg0[%c2] : memref<4xi32, #tpu.memory_space<smem>>
    %c1_i32_105 = arith.constant 1 : i32
    %557 = arith.cmpi eq, %556, %c1_i32_105 : i32
    %558 = vector.extract_strided_slice %25 {offsets = [2, 0, 0], sizes = [1, 2, 32], strides = [1, 1, 1]} : vector<4x2x32xbf16> to vector<1x2x32xbf16>
    %559 = vector.shape_cast %558 : vector<1x2x32xbf16> to vector<2x32xbf16>
    %560 = arith.truncf %554 : vector<2x32xf32> to vector<2x32xbf16>
    %561 = arith.select %557, %559, %560 : vector<2x32xbf16>
    %562 = arith.truncf %528 : vector<2x32xf32> to vector<2x32xbf16>
    %563 = tpu.concatenate %561, %562 in 1 : vector<2x32xbf16>, vector<2x32xbf16> -> vector<2x64xbf16>
    %cst_106 = arith.constant dense<0.000000e+00> : vector<2x128xf32>
    %564 = tpu.matmul %563, %5, %cst_106 {dimension_numbers = #tpu.dot_dimension_numbers<[1], [0], [0], [1], [0, 0, 1, 1], [], []>} : vector<2x64xbf16>, vector<64x128xbf16>, vector<2x128xf32> -> vector<2x128xf32>
    %565 = arith.addf %564, %15 : vector<2x128xf32>
    %566 = vector.extract_strided_slice %565 {offsets = [0, 0], sizes = [2, 64], strides = [1, 1]} : vector<2x128xf32> to vector<2x64xf32>
    %567 = arith.negf %566 : vector<2x64xf32>
    %568 = math.exp %567 : vector<2x64xf32>
    %cst_107 = arith.constant 1.000000e+00 : f32
    %569 = vector.broadcast %cst_107 : f32 to vector<2x64xf32>
    %570 = arith.addf %569, %568 : vector<2x64xf32>
    %571 = arith.divf %569, %570 : vector<2x64xf32>
    %572 = vector.extract_strided_slice %571 {offsets = [0, 0], sizes = [2, 32], strides = [1, 1]} : vector<2x64xf32> to vector<2x32xf32>
    %573 = vector.extract_strided_slice %571 {offsets = [0, 32], sizes = [2, 32], strides = [1, 1]} : vector<2x64xf32> to vector<2x32xf32>
    %574 = vector.extract_strided_slice %565 {offsets = [0, 64], sizes = [2, 32], strides = [1, 1]} : vector<2x128xf32> to vector<2x32xf32>
    %575 = vector.extract_strided_slice %565 {offsets = [0, 96], sizes = [2, 32], strides = [1, 1]} : vector<2x128xf32> to vector<2x32xf32>
    %576 = arith.mulf %572, %575 : vector<2x32xf32>
    %577 = arith.addf %574, %576 : vector<2x32xf32>
    %578 = math.tanh %577 : vector<2x32xf32>
    %cst_108 = arith.constant 1.000000e+00 : f32
    %579 = vector.broadcast %cst_108 : f32 to vector<2x32xf32>
    %580 = arith.subf %579, %573 : vector<2x32xf32>
    %581 = arith.mulf %580, %578 : vector<2x32xf32>
    %582 = arith.mulf %573, %528 : vector<2x32xf32>
    %583 = arith.addf %581, %582 : vector<2x32xf32>
    %584 = arith.truncf %583 : vector<2x32xf32> to vector<2x32xbf16>
    %585 = arith.truncf %551 : vector<2x32xf32> to vector<2x32xbf16>
    %586 = tpu.concatenate %584, %585 in 1 : vector<2x32xbf16>, vector<2x32xbf16> -> vector<2x64xbf16>
    %cst_109 = arith.constant dense<0.000000e+00> : vector<2x128xf32>
    %587 = tpu.matmul %586, %7, %cst_109 {dimension_numbers = #tpu.dot_dimension_numbers<[1], [0], [0], [1], [0, 0, 1, 1], [], []>} : vector<2x64xbf16>, vector<64x128xbf16>, vector<2x128xf32> -> vector<2x128xf32>
    %588 = arith.addf %587, %19 : vector<2x128xf32>
    %589 = vector.extract_strided_slice %588 {offsets = [0, 0], sizes = [2, 64], strides = [1, 1]} : vector<2x128xf32> to vector<2x64xf32>
    %590 = arith.negf %589 : vector<2x64xf32>
    %591 = math.exp %590 : vector<2x64xf32>
    %cst_110 = arith.constant 1.000000e+00 : f32
    %592 = vector.broadcast %cst_110 : f32 to vector<2x64xf32>
    %593 = arith.addf %592, %591 : vector<2x64xf32>
    %594 = arith.divf %592, %593 : vector<2x64xf32>
    %595 = vector.extract_strided_slice %594 {offsets = [0, 0], sizes = [2, 32], strides = [1, 1]} : vector<2x64xf32> to vector<2x32xf32>
    %596 = vector.extract_strided_slice %594 {offsets = [0, 32], sizes = [2, 32], strides = [1, 1]} : vector<2x64xf32> to vector<2x32xf32>
    %597 = vector.extract_strided_slice %588 {offsets = [0, 64], sizes = [2, 32], strides = [1, 1]} : vector<2x128xf32> to vector<2x32xf32>
    %598 = vector.extract_strided_slice %588 {offsets = [0, 96], sizes = [2, 32], strides = [1, 1]} : vector<2x128xf32> to vector<2x32xf32>
    %599 = arith.mulf %595, %598 : vector<2x32xf32>
    %600 = arith.addf %597, %599 : vector<2x32xf32>
    %601 = math.tanh %600 : vector<2x32xf32>
    %cst_111 = arith.constant 1.000000e+00 : f32
    %602 = vector.broadcast %cst_111 : f32 to vector<2x32xf32>
    %603 = arith.subf %602, %596 : vector<2x32xf32>
    %604 = arith.mulf %603, %601 : vector<2x32xf32>
    %605 = arith.mulf %596, %551 : vector<2x32xf32>
    %606 = arith.addf %604, %605 : vector<2x32xf32>
    %607 = arith.truncf %606 : vector<2x32xf32> to vector<2x32xbf16>
    %cst_112 = arith.constant dense<0.000000e+00> : vector<2x32xf32>
    %608 = tpu.matmul %607, %20, %cst_112 {dimension_numbers = #tpu.dot_dimension_numbers<[1], [0], [0], [1], [0, 0, 1, 1], [], []>} : vector<2x32xbf16>, vector<32x32xbf16>, vector<2x32xf32> -> vector<2x32xf32>
    %609 = arith.addf %608, %23 : vector<2x32xf32>
    %610 = vector.extract_strided_slice %609 {offsets = [0, 0], sizes = [2, 1], strides = [1, 1]} : vector<2x32xf32> to vector<2x1xf32>
    %611 = tpu.concatenate %445, %500, %555, %610 in 1 : vector<2x1xf32>, vector<2x1xf32>, vector<2x1xf32>, vector<2x1xf32> -> vector<2x4xf32>
    %c0_113 = arith.constant 0 : index
    %c0_114 = arith.constant 0 : index
    %612 = vector.load %arg9[%c0_113, %c0_114] : memref<2x4xf32, #tpu.memory_space<vmem>>, vector<2x4xf32>
    tpu.vector_store %arg9[%c0_113, %c0_114], %611 {strides = array<i32>} : memref<2x4xf32, #tpu.memory_space<vmem>>, vector<2x4xf32>,
    return
  }
}

</mosaic_0001>

<bundles_post_ra>
// kernel: tpu_custom_call.1
= control target key start
LH: loop header
LB: loop body
LE: loop exit
PB: predicated region body
PF: predicated region fallthrough
CT: control target
= control target key end

     0   :  { %14 = vsyncpa [#allocation5], 0  ;;  %s3828_s0 = inlined_call_operand.hbm [shape: s32[4], index: 0, kind: input, shape index: {}]   ;;  %s3829_s1 = inlined_call_operand.hbm [shape: bf16[16,32], index: 1, kind: input, shape index: {}]   ;;  %s3830_s2 = inlined_call_operand.vmem [shape: bf16[4,2,32], index: 2, kind: input, shape index: {}]   ;;  %s3831_s3 = inlined_call_operand.hbm [shape: bf16[2,64,128], index: 3, kind: input, shape index: {}]   ;;  %s3832_s4 = inlined_call_operand.vmem [shape: f32[2,1,128], index: 4, kind: input, shape index: {}]   ;;  %s3833_s5 = inlined_call_operand.hbm [shape: bf16[2,64,128], index: 5, kind: input, shape index: {}]   ;;  %s3834_s6 = inlined_call_operand.vmem [shape: f32[2,1,128], index: 6, kind: input, shape index: {}]   ;;  %s3835_s7 = inlined_call_operand.vmem [shape: bf16[32,32], index: 7, kind: input, shape index: {}]   ;;  %s3836_s8 = inlined_call_operand.vmem [shape: f32[1,32], index: 8, kind: input, shape index: {}]   ;;  %s3837_s9 = inlined_call_operand.hbm [shape: f32[2,4], index: 9, kind: output, shape index: {}]  }
   0x1   :  { %15 = vsyncpa [#allocation3], 0 }
   0x2   :  { %16 = vsyncpa [#allocation8], 0 }
   0x3   :  { %17 = vsyncpa [#allocation4], 0  ;;  %s3091_s30 = smov [#allocation7]   ;;  %s3092_s11 = smov [#allocation6]  }
   0x4   :  { %s45_s10 = sshll.u32 %s3091_s30, 4  ;;  %s31_s12 = sshll.u32 %s3092_s11, 4  ;;  %s46_s10 = int_to_ptr.vmem [resolvable:$true] %s45_s10  ;;  %s32_s12 = int_to_ptr.vmem [resolvable:$true] %s31_s12 }
   0x5   :  { %s2985_s15 = scalar_lea.hbm %s3831_s3, 1024 }
   0x6   :  { %p2986_p0 = scmp.ne.s32.totalorder %s3831_s3, %s2985_s15  ;;  %p2989_p1 = scmp.lt.u32.totalorder %s2985_s15, %s3831_s3 }
   0x8   :  { %p2991_p2 = pnand %p2989_p1, %p2986_p0 }
   0xa   :  { %2994 = shalt.err (!%p2991_p2)
}
   0xb   :  { %s2995_s20 = scalar_lea.vmem %s46_s10, 1024  ;;  %p3000_p4 = scmp.lt.s32.totalorder %s46_s10, %s46_s10 }
   0xc   :  { %p2996_p3 = scmp.ne.s32.totalorder %s46_s10, %s2995_s20  ;;  %p3001_p5 = scmp.lt.s32.totalorder %s2995_s20, %s2995_s20 }
   0xe   :  { %p3002_p6 = por %p3001_p5, %p3000_p4 }
  0x10   :  { %p3003_p7 = pnand %p3002_p6, %p2996_p3 }
  0x12   :  { %3006 = shalt.err (!%p3003_p7)
}
  0x13   :  { %s3093_s21 = smov 64   ;;  %s3094_s22 = smov 4  }
  0x14   :  { %51 = dma.hbm_to_vmem [thread:$0]  %s3831_s3, 1024, %s46_s10, [#allocation8], %s3093_s21, %s3093_s21, %s3094_s22  }
  0x15   :  { %s3007_s27 = scalar_lea.hbm %s3828_s0, 16 }
  0x16   :  { %p3008_p8 = scmp.ne.s32.totalorder %s3828_s0, %s3007_s27  ;;  %p3011_p9 = scmp.lt.u32.totalorder %s3007_s27, %s3828_s0 }
  0x18   :  { %p3013_p10 = pnand %p3011_p9, %p3008_p8 }
  0x1a   :  { %3016 = shalt.err (!%p3013_p10)
}
  0x1b   :  { %s3095_s13 = smov [#allocation2]   ;;  %s3017_s16 = scalar_lea.hbm %s3829_s1, 128 }
  0x1c   :  { %25 = dma.hbm_to_smem %s3828_s0, 16, %s3095_s13, [#allocation5]  }
  0x1d   :  { %p3018_p11 = scmp.ne.s32.totalorder %s3829_s1, %s3017_s16  ;;  %p3021_p12 = scmp.lt.u32.totalorder %s3017_s16, %s3829_s1 }
  0x1f   :  { %p3023_p13 = pnand %p3021_p12, %p3018_p11 }
  0x21   :  { %3026 = shalt.err (!%p3023_p13)
}
  0x22   :  { %s3027_s23 = scalar_lea.vmem %s32_s12, 128  ;;  %p3032_p1 = scmp.lt.s32.totalorder %s32_s12, %s32_s12 }
  0x23   :  { %p3028_p0 = scmp.ne.s32.totalorder %s32_s12, %s3027_s23  ;;  %p3033_p2 = scmp.lt.s32.totalorder %s3027_s23, %s3027_s23 }
  0x25   :  { %p3034_p3 = por %p3033_p2, %p3032_p1 }
  0x27   :  { %p3035_p4 = pnand %p3034_p3, %p3028_p0 }
  0x29   :  { %3038 = shalt.err (!%p3035_p4)
}
  0x2a   :  { %37 = dma.hbm_to_vmem [thread:$0]  %s3829_s1, 128, %s32_s12, [#allocation3], %s3093_s21, %s3093_s21, %s3094_s22  }
  0x2b   :  { %s3096_s25 = smov [#allocation9]   ;;  %s3039_s29 = scalar_lea.hbm %s3833_s5, 1024 }
  0x2c   :  { %s59_s26 = sshll.u32 %s3096_s25, 4  ;;  %p3040_p5 = scmp.ne.s32.totalorder %s3833_s5, %s3039_s29  ;;  %s60_s26 = int_to_ptr.vmem [resolvable:$true] %s59_s26 }
  0x2d   :  { %p3043_p6 = scmp.lt.u32.totalorder %s3039_s29, %s3833_s5 }
  0x2f   :  { %p3045_p7 = pnand %p3043_p6, %p3040_p5 }
  0x31   :  { %3048 = shalt.err (!%p3045_p7)
}
  0x32   :  { %s3049_s15 = scalar_lea.vmem %s60_s26, 1024  ;;  %p3054_p9 = scmp.lt.s32.totalorder %s60_s26, %s60_s26 }
  0x33   :  { %p3050_p8 = scmp.ne.s32.totalorder %s60_s26, %s3049_s15  ;;  %p3055_p10 = scmp.lt.s32.totalorder %s3049_s15, %s3049_s15 }
  0x35   :  { %p3056_p11 = por %p3055_p10, %p3054_p9 }
  0x37   :  { %p3057_p12 = pnand %p3056_p11, %p3050_p8 }
  0x39   :  { %3060 = shalt.err (!%p3057_p12)
}
  0x3a   :  { %65 = dma.hbm_to_vmem [thread:$0]  %s3833_s5, 1024, %s60_s26, [#allocation8], %s3093_s21, %s3093_s21, %s3094_s22  }
  0x3b   :  { %3083 = dma.done.wait [#allocation5], 16  }
  0x3c   :  { %3084 = vsyncadd [#allocation5], 4294967280 }
  0x3d   :  { %3085 = dma.done.wait [#allocation3], 128  }
  0x3e   :  { %3086 = vsyncadd [#allocation3], 4294967168 }
  0x3f   :  { %3087 = dma.done.wait [#allocation8], 2048  }
  0x40   :  { %3088 = vsyncadd [#allocation8], 4294965248 }
  0x41   :  { %84 = sfence }
  0x42   :  { %v2821_v0 = vld [vmem:[#allocation7] sm:$0xff]   ;;  %v3097_v1 = vmov 0.0   ;;  %v3215_v2 = vld [vmem:[#allocation7 + $0x10] sm:$0xff]   ;;  %v2823_v3 = vld [vmem:[#allocation7 + $0x8] sm:$0xff]   ;;  %vm3098_vm0 = vmmov 0   ;;  %vm184_vm1 = vcmask 261120  }
  0x43   :  { %2510 = vmatprep.subr.bf16.mxu0 %v3097_v1  ;;  %2518 = vmatprep.subr.bf16.mxu1 %v3097_v1  ;;  %v3221_v4 = vld [vmem:[#allocation7 + $0x18] sm:$0xff]   ;;  %v3099_v8 = vmov 0   ;;  %v2317_v9 = vld [vmem:[%s3832_s4] ss:$0 sm:$0xff]  ;;  %s3100_s3 = smov 32   ;;  %v3249_v29 = vld [vmem:[#allocation7 + $0x20] sm:$0xff]  }
  0x44   :  { %2511 = vmatpush3.bf16.msra.mxu0 %v2821_v0  ;;  %2514 = vmatprep.mubr.msk.bf16.mxu0 %vm3098_vm0, %v3097_v1  ;;  %v155_v5 = vld [vmem:[#allocation6] sm:$0xf]  ;;  %v156_v6 = vld [vmem:[#allocation6 + $0x4] sm:$0xf]  ;;  %v3252_v30 = vld [vmem:[#allocation7 + $0x28] sm:$0xff]   ;;  %s3101_s10 = smov 96  }
  0x45   :  { %2519 = vmatpush3.bf16.msra.mxu1 %v3215_v2  ;;  %2512 = vmatprep.subr.bf16.mxu0 %v3097_v1  ;;  %v2318_v7 = vcombine.low %v155_v5, %v156_v6  ;;  %v3256_v32 = vld [vmem:[#allocation7 + $0x30] sm:$0xff]   ;;  %v3261_v33 = vld [vmem:[#allocation7 + $0x38] sm:$0xff]   ;;  %vm339_vm2 = vcmask 523264   ;;  %s2385_s14 = sld [smem:[#allocation2 + $0x2]]  ;;  %s3103_s5 = smov 2   ;;  %vm2286_vm9 = vcmask 7168  }
  0x46   :  { %2520 = vmatprep.subr.bf16.mxu1 %v3097_v1  ;;  %2522 = vmatprep.mubr.msk.bf16.mxu1 %vm3098_vm0, %v3097_v1  ;;  %v3292_v61 = vld [vmem:[%s3832_s4 + $0x1] ss:$0 sm:$0xff]  ;;  %vm2288_vm10 = vcmask 15360   ;;  %s3105_s22 = smov [#allocation10]   ;;  %vm2290_vm11 = vcmask 23552   ;;  %vm2292_vm12 = vcmask 25600  }
  0x48   :  { %2513 = vmatpush3.bf16.msra.mxu0 %v2823_v3 }
  0x49   :  { %2521 = vmatpush3.bf16.msra.mxu1 %v3221_v4  ;;  %2526 = vmatprep.subr.bf16.mxu0 %v3097_v1 }
  0x4a   :  { %2538 = vmatprep.subr.bf16.mxu1 %v3097_v1 }
  0x4b   :  { %2515 = vmatmul.mubr.msk.bf16.vlgmr.msra.gmra.mrb[0].mxu0 %vm184_vm1, %v2318_v7  ;;  %p2074_p1 = scmp.eq.s32.totalorder %s2385_s14, 1 }
  0x4c   :  { %2523 = vmatmul.mubr.bf16.vlgmr.msra.gmra.mrb[0].mxu1 %v3099_v8  ;;  %2534 = vmatprep.mubr.msk.bf16.mxu0 %vm3098_vm0, %v3097_v1 }
  0x4d   :  { %2539 = vmatpush3.bf16.msra.mxu1 %v3215_v2  ;;  %2542 = vmatprep.mubr.msk.bf16.mxu1 %vm3098_vm0, %v3097_v1  ;;  %s2076_s15 = scalar_select %p2074_p1, 1, 0 }
  0x4e   :  { %2540 = vmatprep.subr.bf16.mxu1 %v3097_v1  ;;  %2527 = vmatpush3.bf16.msra.mxu0 %v3249_v29 }
  0x4f   :  { %2528 = vmatprep.subr.bf16.mxu0 %v3097_v1 }
  0x51   :  { %2541 = vmatpush3.bf16.msra.mxu1 %v3221_v4 }
  0x52   :  { %2546 = vmatprep.subr.bf16.mxu1 %v3097_v1  ;;  %2529 = vmatpush3.bf16.msra.mxu0 %v3252_v30 }
  0x53   :  { %2530 = vmatprep.subr.bf16.mxu0 %v3097_v1 }
  0x56   :  { %2531 = vmatpush3.bf16.msra.mxu0 %v3256_v32 }
  0x57   :  { %2532 = vmatprep.subr.bf16.mxu0 %v3097_v1 }
  0x5a   :  { %2533 = vmatpush3.bf16.msra.mxu0 %v3261_v33 }
  0x5b   :  { %2558 = vmatprep.subr.bf16.mxu0 %v3097_v1 }
 0x11e   :  { %v222_v10 = vpop.f32.mrb[0].mxu0 }
 0x11f   :  { %v3242_v11 = vadd.f32 %v2317_v9, %v222_v10  ;;  %v278_v12 = vpop.f32.mrb[0].mxu1  ;;  %v2516_v13 = vpop.f32.mrb[1].mxu0 }
 0x120   :  { %v2524_v14 = vpop.f32.mrb[1].mxu1  ;;  %v225_v15 = vpop.f32.mrb[2].mxu0 }
 0x121   :  { %v279_v16 = vadd.f32 %v278_v12, %v3242_v11  ;;  %v3245_v17 = vadd.f32 %v2317_v9, %v225_v15  ;;  %v281_v18 = vpop.f32.mrb[2].mxu1  ;;  %v2517_v19 = vpop.f32.mrb[3].mxu0  ;;  %v408_v42 = vrot.slane %v3242_v11, 2 }
 0x122   :  { %v2525_v20 = vpop.f32.mrb[3].mxu1 }
 0x123   :  { %291 = vrot.lane.b32.xlu0 %v279_v16, %s3100_s3  ;;  %v2324_v21 = vmul.f32 -1.442695, %v279_v16  ;;  %v552_v20 = vrot.slane %v3242_v11, 4 }
 0x125   :  { %2840 = vpow2.f32 %v2324_v21 }
 0x12f   :  { %v2841_v22 = vpop.eup %2840 }
 0x130   :  { %v287_v23 = vadd.f32 1.0, %v2841_v22 }
 0x132   :  { %2842 = vrcp.f32 %v287_v23 }
 0x13c   :  { %v2843_v24 = vpop.eup %2842 }
 0x13d   :  { %v301_v34 = vsub.f32 1.0, %v2843_v24  ;;  %v307_v36 = vmul.f32 0.0, %v2843_v24 }
 0x195   :  { %v292_v25 = vpop.permute.xlu0 %291 }
 0x196   :  { %v294_v26 = vmul.f32 %v2843_v24, %v292_v25 }
 0x198   :  { %296 = vrot.lane.b32.xlu0 %v294_v26, %s3093_s21 }
 0x20a   :  { %v297_v27 = vpop.permute.xlu0 %296 }
 0x20b   :  { %v299_v28 = vadd.f32 %v297_v27, %v279_v16 }
 0x20d   :  { %2844 = vtanh.f32 %v299_v28 }
 0x217   :  { %v2845_v31 = vpop.eup %2844 }
 0x218   :  { %303 = vrot.lane.b32.xlu1 %v2845_v31, %s3101_s10 }
 0x28a   :  { %v304_v35 = vpop.permute.xlu1 %303 }
 0x28b   :  { %v306_v37 = vmul.f32 %v304_v35, %v301_v34 }
 0x28d   :  { %v308_v38 = vadd.f32 %v307_v36, %v306_v37 }
 0x28f   :  { %v309_v39 = vpack.c.bf16 %v308_v38, %v308_v38 }
 0x291   :  { %311 = vrot.lane.b32.xlu1 %v309_v39, %s3101_s10 }
 0x303   :  { %v312_v40 = vpop.permute.xlu1 %311 }
 0x304   :  { %v314_v41 = vsel %vm184_vm1, %v312_v40, 0  ;;  %2543 = vmatmul.mubr.msk.bf16.vlgmr.msra.gmra.mrb[4].mxu1 %vm184_vm1, %v312_v40 }
 0x305   :  { %2535 = vmatmul.mubr.msk.bf16.vlgmr.msra.gmra.mrb[4].mxu0 %vm339_vm2, %v314_v41  ;;  %2547 = vmatpush3.bf16.msra.mxu1 %v3249_v29 }
 0x306   :  { %2559 = vmatpush3.bf16.msra.mxu0 %v3215_v2  ;;  %2562 = vmatprep.mubr.msk.bf16.mxu0 %vm3098_vm0, %v3097_v1 }
 0x307   :  { %2560 = vmatprep.subr.bf16.mxu0 %v3097_v1  ;;  %2548 = vmatprep.subr.bf16.mxu1 %v3097_v1 }
 0x308   :  { %2554 = vmatprep.mubr.msk.bf16.mxu1 %vm3098_vm0, %v3097_v1 }
 0x309   :  { %2549 = vmatpush3.bf16.msra.mxu1 %v3252_v30 }
 0x30a   :  { %2561 = vmatpush3.bf16.msra.mxu0 %v3221_v4  ;;  %2550 = vmatprep.subr.bf16.mxu1 %v3097_v1 }
 0x30b   :  { %2566 = vmatprep.subr.bf16.mxu0 %v3097_v1 }
 0x30d   :  { %2551 = vmatpush3.bf16.msra.mxu1 %v3256_v32 }
 0x30e   :  { %2552 = vmatprep.subr.bf16.mxu1 %v3097_v1 }
 0x311   :  { %2553 = vmatpush3.bf16.msra.mxu1 %v3261_v33 }
 0x312   :  { %2578 = vmatprep.subr.bf16.mxu1 %v3097_v1 }
 0x3d7   :  { %v446_v43 = vpop.f32.mrb[4].mxu1 }
 0x3d8   :  { %v447_v44 = vadd.f32 %v446_v43, %v408_v42  ;;  %v376_v45 = vpop.f32.mrb[4].mxu0  ;;  %v2544_v46 = vpop.f32.mrb[5].mxu1 }
 0x3d9   :  { %v2536_v47 = vpop.f32.mrb[5].mxu0  ;;  %v449_v48 = vpop.f32.mrb[6].mxu1  ;;  %v377_v62 = vadd.f32 %v3292_v61, %v376_v45 }
 0x3da   :  { %459 = vrot.lane.b32.xlu0 %v447_v44, %s3100_s3  ;;  %v379_v49 = vpop.f32.mrb[6].mxu0  ;;  %v2545_v50 = vpop.f32.mrb[7].mxu1  ;;  %v2332_v52 = vmul.f32 -1.442695, %v447_v44 }
 0x3db   :  { %v2537_v51 = vpop.f32.mrb[7].mxu0  ;;  %v2330_v63 = vmul.f32 -1.442695, %v377_v62 }
 0x3dc   :  { %2846 = vpow2.f32 %v2332_v52 }
 0x3e6   :  { %v2847_v53 = vpop.eup %2846 }
 0x3e7   :  { %v455_v54 = vadd.f32 1.0, %v2847_v53 }
 0x3e9   :  { %2848 = vrcp.f32 %v455_v54 }
 0x3f3   :  { %v2849_v55 = vpop.eup %2848 }
 0x3f4   :  { %v469_v5 = vsub.f32 1.0, %v2849_v55  ;;  %v475_v7 = vmul.f32 %v2849_v55, %v308_v38 }
 0x44c   :  { %v460_v56 = vpop.permute.xlu0 %459 }
 0x44d   :  { %v462_v57 = vmul.f32 %v2849_v55, %v460_v56 }
 0x44f   :  { %464 = vrot.lane.b32.xlu1 %v462_v57, %s3093_s21 }
 0x4c1   :  { %v465_v58 = vpop.permute.xlu1 %464 }
 0x4c2   :  { %v467_v59 = vadd.f32 %v465_v58, %v447_v44 }
 0x4c4   :  { %2850 = vtanh.f32 %v467_v59 }
 0x4c5   :  { %2852 = vpow2.f32 %v2330_v63 }
 0x4ce   :  { %v2851_v60 = vpop.eup %2850 }
 0x4cf   :  { %471 = vrot.lane.b32.xlu0 %v2851_v60, %s3101_s10  ;;  %v2853_v0 = vpop.eup %2852 }
 0x4d0   :  { %v385_v3 = vadd.f32 1.0, %v2853_v0 }
 0x4d2   :  { %2854 = vrcp.f32 %v385_v3 }
 0x4d3   :  { %389 = vrot.lane.b32.xlu0 %v377_v62, %s3100_s3 }
 0x4dc   :  { %v2855_v14 = vpop.eup %2854 }
 0x4dd   :  { %v399_v37 = vsub.f32 1.0, %v2855_v14  ;;  %v405_v39 = vmul.f32 0.0, %v2855_v14 }
 0x541   :  { %v472_v6 = vpop.permute.xlu0 %471 }
 0x542   :  { %v474_v9 = vmul.f32 %v472_v6, %v469_v5 }
 0x544   :  { %v3297_v10 = vadd.f32 %v475_v7, %v474_v9  ;;  %v696_v9 = vrot.slane %v3242_v11, 6 }
 0x545   :  { %v390_v13 = vpop.permute.xlu0 %389 }
 0x546   :  { %v477_v12 = vpack.c.bf16 %v3297_v10, %v3297_v10  ;;  %v392_v15 = vmul.f32 %v2855_v14, %v390_v13 }
 0x548   :  { %480 = vrot.lane.b32.xlu1 %v477_v12, %s3101_s10 }
 0x54c   :  { %394 = vrot.lane.b32.xlu1 %v392_v15, %s3093_s21 }
 0x5ba   :  { %v481_v16 = vpop.permute.xlu1 %480 }
 0x5bb   :  { %2563 = vmatmul.mubr.msk.bf16.vlgmr.msra.gmra.mrb[8].mxu0 %vm184_vm1, %v481_v16 }
 0x5bc   :  { %2567 = vmatpush3.bf16.msra.mxu0 %v3249_v29  ;;  %2574 = vmatprep.mubr.msk.bf16.mxu0 %vm3098_vm0, %v3097_v1 }
 0x5bd   :  { %2568 = vmatprep.subr.bf16.mxu0 %v3097_v1 }
 0x5be   :  { %v395_v18 = vpop.permute.xlu1 %394 }
 0x5bf   :  { %v397_v19 = vadd.f32 %v395_v18, %v377_v62 }
 0x5c0   :  { %2569 = vmatpush3.bf16.msra.mxu0 %v3252_v30 }
 0x5c1   :  { %2570 = vmatprep.subr.bf16.mxu0 %v3097_v1  ;;  %2856 = vtanh.f32 %v397_v19 }
 0x5c4   :  { %2571 = vmatpush3.bf16.msra.mxu0 %v3256_v32 }
 0x5c5   :  { %2572 = vmatprep.subr.bf16.mxu0 %v3097_v1 }
 0x5c8   :  { %2573 = vmatpush3.bf16.msra.mxu0 %v3261_v33 }
 0x5c9   :  { %2598 = vmatprep.subr.bf16.mxu0 %v3097_v1 }
 0x5cb   :  { %v2857_v26 = vpop.eup %2856 }
 0x68e   :  { %v590_v21 = vpop.f32.mrb[8].mxu0 }
 0x68f   :  { %v591_v22 = vadd.f32 %v590_v21, %v552_v20  ;;  %v2564_v23 = vpop.f32.mrb[9].mxu0 }
 0x690   :  { %v593_v24 = vpop.f32.mrb[10].mxu0 }
 0x691   :  { %603 = vrot.lane.b32.xlu0 %v591_v22, %s3100_s3  ;;  %v2565_v25 = vpop.f32.mrb[11].mxu0  ;;  %v2336_v27 = vmul.f32 -1.442695, %v591_v22 }
 0x693   :  { %2858 = vpow2.f32 %v2336_v27 }
 0x695   :  { %401 = vrot.lane.b32.xlu0 %v2857_v26, %s3101_s10 }
 0x69d   :  { %v2859_v28 = vpop.eup %2858 }
 0x69e   :  { %v599_v31 = vadd.f32 1.0, %v2859_v28 }
 0x6a0   :  { %2860 = vrcp.f32 %v599_v31 }
 0x6aa   :  { %v2861_v34 = vpop.eup %2860 }
 0x6ab   :  { %v613_v52 = vsub.f32 1.0, %v2861_v34  ;;  %v619_v54 = vmul.f32 %v2861_v34, %v3297_v10 }
 0x703   :  { %v604_v35 = vpop.permute.xlu0 %603 }
 0x704   :  { %v606_v36 = vmul.f32 %v2861_v34, %v604_v35 }
 0x706   :  { %608 = vrot.lane.b32.xlu1 %v606_v36, %s3093_s21 }
 0x707   :  { %v402_v38 = vpop.permute.xlu0 %401 }
 0x708   :  { %v404_v40 = vmul.f32 %v402_v38, %v399_v37 }
 0x70a   :  { %v406_v41 = vadd.f32 %v405_v39, %v404_v40 }
 0x70c   :  { %v478_v42 = vpack.c.bf16 %v406_v41, %v406_v41 }
 0x70e   :  { %v484_v43 = vsel %vm184_vm1, %v481_v16, %v478_v42 }
 0x70f   :  { %2555 = vmatmul.mubr.msk.bf16.vlgmr.msra.gmra.mrb[8].mxu1 %vm339_vm2, %v484_v43 }
 0x710   :  { %2579 = vmatpush3.bf16.msra.mxu1 %v3215_v2  ;;  %2582 = vmatprep.mubr.msk.bf16.mxu1 %vm3098_vm0, %v3097_v1 }
 0x711   :  { %2580 = vmatprep.subr.bf16.mxu1 %v3097_v1 }
 0x714   :  { %2581 = vmatpush3.bf16.msra.mxu1 %v3221_v4 }
 0x715   :  { %2586 = vmatprep.subr.bf16.mxu1 %v3097_v1 }
 0x778   :  { %v609_v44 = vpop.permute.xlu1 %608 }
 0x779   :  { %v611_v45 = vadd.f32 %v609_v44, %v591_v22 }
 0x77b   :  { %2862 = vtanh.f32 %v611_v45 }
 0x785   :  { %v2863_v46 = vpop.eup %2862 }
 0x786   :  { %615 = vrot.lane.b32.xlu1 %v2863_v46, %s3101_s10 }
 0x7e2   :  { %v521_v47 = vpop.f32.mrb[8].mxu1 }
 0x7e3   :  { %v522_v48 = vadd.f32 %v3292_v61, %v521_v47  ;;  %v2556_v49 = vpop.f32.mrb[9].mxu1 }
 0x7e4   :  { %v524_v50 = vpop.f32.mrb[10].mxu1 }
 0x7e5   :  { %v2557_v51 = vpop.f32.mrb[11].mxu1  ;;  %534 = vrot.lane.b32.xlu1 %v522_v48, %s3100_s3  ;;  %v2334_v58 = vmul.f32 -1.442695, %v522_v48 }
 0x7e7   :  { %2864 = vpow2.f32 %v2334_v58 }
 0x7f1   :  { %v2865_v59 = vpop.eup %2864 }
 0x7f2   :  { %v530_v60 = vadd.f32 1.0, %v2865_v59 }
 0x7f4   :  { %2866 = vrcp.f32 %v530_v60 }
 0x7f8   :  { %v616_v53 = vpop.permute.xlu1 %615 }
 0x7f9   :  { %v618_v55 = vmul.f32 %v616_v53, %v613_v52 }
 0x7fb   :  { %v3330_v56 = vadd.f32 %v619_v54, %v618_v55 }
 0x7fd   :  { %v621_v57 = vpack.c.bf16 %v3330_v56, %v3330_v56 }
 0x7fe   :  { %v2867_v62 = vpop.eup %2866 }
 0x7ff   :  { %624 = vrot.lane.b32.xlu0 %v621_v57, %s3101_s10  ;;  %v544_v16 = vsub.f32 1.0, %v2867_v62  ;;  %v550_v19 = vmul.f32 %v2867_v62, %v406_v41 }
 0x857   :  { %v535_v63 = vpop.permute.xlu1 %534 }
 0x858   :  { %v537_v0 = vmul.f32 %v2867_v62, %v535_v63 }
 0x85a   :  { %539 = vrot.lane.b32.xlu0 %v537_v0, %s3093_s21 }
 0x871   :  { %v625_v3 = vpop.permute.xlu0 %624 }
 0x872   :  { %2583 = vmatmul.mubr.msk.bf16.vlgmr.msra.gmra.mrb[12].mxu1 %vm184_vm1, %v625_v3 }
 0x873   :  { %2587 = vmatpush3.bf16.msra.mxu1 %v3249_v29  ;;  %2594 = vmatprep.mubr.msk.bf16.mxu1 %vm3098_vm0, %v3097_v1 }
 0x874   :  { %2588 = vmatprep.subr.bf16.mxu1 %v3097_v1 }
 0x877   :  { %2589 = vmatpush3.bf16.msra.mxu1 %v3252_v30 }
 0x878   :  { %2590 = vmatprep.subr.bf16.mxu1 %v3097_v1 }
 0x87b   :  { %2591 = vmatpush3.bf16.msra.mxu1 %v3256_v32 }
 0x87c   :  { %2592 = vmatprep.subr.bf16.mxu1 %v3097_v1 }
 0x87f   :  { %2593 = vmatpush3.bf16.msra.mxu1 %v3261_v33 }
 0x880   :  { %2618 = vmatprep.subr.bf16.mxu1 %v3097_v1 }
 0x8cc   :  { %v540_v5 = vpop.permute.xlu0 %539 }
 0x8cd   :  { %v542_v6 = vadd.f32 %v540_v5, %v522_v48 }
 0x8cf   :  { %2868 = vtanh.f32 %v542_v6 }
 0x8d9   :  { %v2869_v7 = vpop.eup %2868 }
 0x8da   :  { %546 = vrot.lane.b32.xlu0 %v2869_v7, %s3101_s10 }
 0x945   :  { %v734_v10 = vpop.f32.mrb[12].mxu1 }
 0x946   :  { %v735_v12 = vadd.f32 %v734_v10, %v696_v9  ;;  %v2584_v13 = vpop.f32.mrb[13].mxu1 }
 0x947   :  { %v737_v14 = vpop.f32.mrb[14].mxu1 }
 0x948   :  { %747 = vrot.lane.b32.xlu1 %v735_v12, %s3100_s3  ;;  %v2585_v15 = vpop.f32.mrb[15].mxu1  ;;  %v2340_v11 = vmul.f32 -1.442695, %v735_v12 }
 0x94a   :  { %2870 = vpow2.f32 %v2340_v11 }
 0x94c   :  { %v547_v18 = vpop.permute.xlu0 %546 }
 0x94d   :  { %v549_v20 = vmul.f32 %v547_v18, %v544_v16 }
 0x94f   :  { %v3350_v21 = vadd.f32 %v550_v19, %v549_v20 }
 0x951   :  { %v622_v22 = vpack.c.bf16 %v3350_v21, %v3350_v21 }
 0x953   :  { %v628_v23 = vsel %vm184_vm1, %v625_v3, %v622_v22 }
 0x954   :  { %2575 = vmatmul.mubr.msk.bf16.vlgmr.msra.gmra.mrb[12].mxu0 %vm339_vm2, %v628_v23  ;;  %v2871_v24 = vpop.eup %2870 }
 0x955   :  { %2599 = vmatpush3.bf16.msra.mxu0 %v3215_v2  ;;  %2602 = vmatprep.mubr.msk.bf16.mxu0 %vm3098_vm0, %v3097_v1  ;;  %v743_v25 = vadd.f32 1.0, %v2871_v24 }
 0x956   :  { %2600 = vmatprep.subr.bf16.mxu0 %v3097_v1 }
 0x957   :  { %2872 = vrcp.f32 %v743_v25 }
 0x959   :  { %2601 = vmatpush3.bf16.msra.mxu0 %v3221_v4 }
 0x95a   :  { %2606 = vmatprep.subr.bf16.mxu0 %v3097_v1 }
 0x961   :  { %v2873_v26 = vpop.eup %2872 }
 0x962   :  { %v757_v44 = vsub.f32 1.0, %v2873_v26  ;;  %v763_v46 = vmul.f32 %v2873_v26, %v3330_v56 }
 0x9ba   :  { %v748_v27 = vpop.permute.xlu1 %747 }
 0x9bb   :  { %v750_v28 = vmul.f32 %v2873_v26, %v748_v27 }
 0x9bd   :  { %752 = vrot.lane.b32.xlu1 %v750_v28, %s3093_s21 }
 0xa27   :  { %v665_v31 = vpop.f32.mrb[12].mxu0 }
 0xa28   :  { %v2576_v34 = vpop.f32.mrb[13].mxu0  ;;  %v666_v40 = vadd.f32 %v3292_v61, %v665_v31 }
 0xa29   :  { %v668_v35 = vpop.f32.mrb[14].mxu0 }
 0xa2a   :  { %v2577_v36 = vpop.f32.mrb[15].mxu0  ;;  %v2338_v41 = vmul.f32 -1.442695, %v666_v40 }
 0xa2f   :  { %v753_v37 = vpop.permute.xlu1 %752 }
 0xa30   :  { %v755_v38 = vadd.f32 %v753_v37, %v735_v12 }
 0xa32   :  { %2874 = vtanh.f32 %v755_v38 }
 0xa33   :  { %2876 = vpow2.f32 %v2338_v41 }
 0xa3c   :  { %v2875_v39 = vpop.eup %2874 }
 0xa3d   :  { %759 = vrot.lane.b32.xlu0 %v2875_v39, %s3101_s10  ;;  %v2877_v42 = vpop.eup %2876 }
 0xa3e   :  { %v674_v43 = vadd.f32 1.0, %v2877_v42 }
 0xa40   :  { %2878 = vrcp.f32 %v674_v43 }
 0xa41   :  { %678 = vrot.lane.b32.xlu0 %v666_v40, %s3100_s3 }
 0xa4a   :  { %v2879_v51 = vpop.eup %2878 }
 0xa4b   :  { %v688_v57 = vsub.f32 1.0, %v2879_v51  ;;  %v694_v59 = vmul.f32 %v2879_v51, %v3350_v21 }
 0xaaf   :  { %v760_v45 = vpop.permute.xlu0 %759 }
 0xab0   :  { %v762_v47 = vmul.f32 %v760_v45, %v757_v44 }
 0xab2   :  { %v3367_v48 = vadd.f32 %v763_v46, %v762_v47 }
 0xab3   :  { %v679_v50 = vpop.permute.xlu0 %678 }
 0xab4   :  { %v765_v49 = vpack.c.bf16 %v3367_v48, %v3367_v48  ;;  %v681_v52 = vmul.f32 %v2879_v51, %v679_v50 }
 0xab6   :  { %768 = vrot.lane.b32.xlu1 %v765_v49, %s3101_s10 }
 0xaba   :  { %683 = vrot.lane.b32.xlu1 %v681_v52, %s3093_s21  ;;  %v983_v52 = vrot.slane %v3245_v17, 2 }
 0xb28   :  { %v769_v53 = vpop.permute.xlu1 %768 }
 0xb29   :  { %2603 = vmatmul.mubr.msk.bf16.vlgmr.msra.gmra.mrb[16].mxu0 %vm184_vm1, %v769_v53 }
 0xb2a   :  { %2607 = vmatpush3.bf16.msra.mxu0 %v3249_v29  ;;  %2614 = vmatprep.mubr.msk.bf16.mxu0 %vm3098_vm0, %v3097_v1 }
 0xb2b   :  { %2608 = vmatprep.subr.bf16.mxu0 %v3097_v1 }
 0xb2c   :  { %v684_v54 = vpop.permute.xlu1 %683 }
 0xb2d   :  { %v686_v55 = vadd.f32 %v684_v54, %v666_v40 }
 0xb2e   :  { %2609 = vmatpush3.bf16.msra.mxu0 %v3252_v30 }
 0xb2f   :  { %2880 = vtanh.f32 %v686_v55  ;;  %2610 = vmatprep.subr.bf16.mxu0 %v3097_v1 }
 0xb32   :  { %2611 = vmatpush3.bf16.msra.mxu0 %v3256_v32 }
 0xb33   :  { %2612 = vmatprep.subr.bf16.mxu0 %v3097_v1 }
 0xb36   :  { %2613 = vmatpush3.bf16.msra.mxu0 %v3261_v33 }
 0xb37   :  { %2638 = vmatprep.subr.bf16.mxu0 %v3097_v1 }
 0xb39   :  { %v2881_v56 = vpop.eup %2880 }
 0xb3a   :  { %690 = vrot.lane.b32.xlu0 %v2881_v56, %s3101_s10 }
 0xbac   :  { %v691_v58 = vpop.permute.xlu0 %690 }
 0xbad   :  { %v693_v60 = vmul.f32 %v691_v58, %v688_v57 }
 0xbaf   :  { %v3386_v62 = vadd.f32 %v694_v59, %v693_v60 }
 0xbb1   :  { %v766_v63 = vpack.c.bf16 %v3386_v62, %v3386_v62 }
 0xbb3   :  { %v772_v0 = vsel %vm184_vm1, %v769_v53, %v766_v63 }
 0xbb4   :  { %2595 = vmatmul.mubr.msk.bf16.vlgmr.msra.gmra.mrb[16].mxu1 %vm339_vm2, %v772_v0 }
 0xbb5   :  { %2619 = vmatpush3.bf16.msra.mxu1 %v3215_v2  ;;  %2622 = vmatprep.mubr.msk.bf16.mxu1 %vm3098_vm0, %v3097_v1 }
 0xbb6   :  { %2620 = vmatprep.subr.bf16.mxu1 %v3097_v1 }
 0xbb9   :  { %2621 = vmatpush3.bf16.msra.mxu1 %v3221_v4 }
 0xbba   :  { %2626 = vmatprep.subr.bf16.mxu1 %v3097_v1 }
 0xbfc   :  { %v876_v3 = vpop.f32.mrb[16].mxu0 }
 0xbfd   :  { %v877_v5 = vadd.f32 %v876_v3, %v3245_v17  ;;  %v2604_v6 = vpop.f32.mrb[17].mxu0 }
 0xbfe   :  { %v879_v7 = vpop.f32.mrb[18].mxu0 }
 0xbff   :  { %889 = vrot.lane.b32.xlu1 %v877_v5, %s3100_s3  ;;  %v2605_v9 = vpop.f32.mrb[19].mxu0  ;;  %v2344_v10 = vmul.f32 -1.442695, %v877_v5 }
 0xc01   :  { %2882 = vpow2.f32 %v2344_v10 }
 0xc0b   :  { %v2883_v12 = vpop.eup %2882 }
 0xc0c   :  { %v885_v13 = vadd.f32 1.0, %v2883_v12 }
 0xc0e   :  { %2884 = vrcp.f32 %v885_v13 }
 0xc18   :  { %v2885_v14 = vpop.eup %2884 }
 0xc19   :  { %v899_v28 = vsub.f32 1.0, %v2885_v14  ;;  %v905_v34 = vmul.f32 %v2885_v14, %v3367_v48 }
 0xc71   :  { %v890_v15 = vpop.permute.xlu1 %889 }
 0xc72   :  { %v892_v16 = vmul.f32 %v2885_v14, %v890_v15 }
 0xc74   :  { %894 = vrot.lane.b32.xlu0 %v892_v16, %s3093_s21 }
 0xc87   :  { %v809_v18 = vpop.f32.mrb[16].mxu1 }
 0xc88   :  { %v2596_v19 = vpop.f32.mrb[17].mxu1  ;;  %v810_v24 = vadd.f32 %v3292_v61, %v809_v18 }
 0xc89   :  { %v812_v20 = vpop.f32.mrb[18].mxu1 }
 0xc8a   :  { %v2597_v21 = vpop.f32.mrb[19].mxu1  ;;  %v2342_v25 = vmul.f32 -1.442695, %v810_v24 }
 0xce6   :  { %v895_v22 = vpop.permute.xlu0 %894 }
 0xce7   :  { %v897_v23 = vadd.f32 %v895_v22, %v877_v5 }
 0xce9   :  { %2886 = vtanh.f32 %v897_v23 }
 0xcea   :  { %2888 = vpow2.f32 %v2342_v25 }
 0xcf3   :  { %v2887_v11 = vpop.eup %2886 }
 0xcf4   :  { %901 = vrot.lane.b32.xlu1 %v2887_v11, %s3101_s10  ;;  %v2889_v26 = vpop.eup %2888 }
 0xcf5   :  { %v818_v27 = vadd.f32 1.0, %v2889_v26 }
 0xcf7   :  { %2890 = vrcp.f32 %v818_v27 }
 0xcf8   :  { %822 = vrot.lane.b32.xlu1 %v810_v24, %s3100_s3 }
 0xd01   :  { %v2891_v39 = vpop.eup %2890 }
 0xd02   :  { %v832_v45 = vsub.f32 1.0, %v2891_v39  ;;  %v838_v47 = vmul.f32 %v2891_v39, %v3386_v62 }
 0xd66   :  { %v902_v31 = vpop.permute.xlu1 %901 }
 0xd67   :  { %v904_v35 = vmul.f32 %v902_v31, %v899_v28 }
 0xd69   :  { %v3405_v36 = vadd.f32 %v905_v34, %v904_v35 }
 0xd6a   :  { %v823_v38 = vpop.permute.xlu1 %822 }
 0xd6b   :  { %v907_v37 = vpack.c.bf16 %v3405_v36, %v3405_v36  ;;  %v825_v40 = vmul.f32 %v2891_v39, %v823_v38 }
 0xd6d   :  { %910 = vrot.lane.b32.xlu0 %v907_v37, %s3101_s10 }
 0xd71   :  { %827 = vrot.lane.b32.xlu0 %v825_v40, %s3093_s21 }
 0xddf   :  { %v911_v41 = vpop.permute.xlu0 %910 }
 0xde0   :  { %2623 = vmatmul.mubr.msk.bf16.vlgmr.msra.gmra.mrb[20].mxu1 %vm184_vm1, %v911_v41 }
 0xde1   :  { %2627 = vmatpush3.bf16.msra.mxu1 %v3249_v29  ;;  %2634 = vmatprep.mubr.msk.bf16.mxu1 %vm3098_vm0, %v3097_v1 }
 0xde2   :  { %2628 = vmatprep.subr.bf16.mxu1 %v3097_v1 }
 0xde3   :  { %v828_v42 = vpop.permute.xlu0 %827 }
 0xde4   :  { %v830_v43 = vadd.f32 %v828_v42, %v810_v24 }
 0xde5   :  { %2629 = vmatpush3.bf16.msra.mxu1 %v3252_v30 }
 0xde6   :  { %2892 = vtanh.f32 %v830_v43  ;;  %2630 = vmatprep.subr.bf16.mxu1 %v3097_v1 }
 0xde9   :  { %2631 = vmatpush3.bf16.msra.mxu1 %v3256_v32 }
 0xdea   :  { %2632 = vmatprep.subr.bf16.mxu1 %v3097_v1 }
 0xded   :  { %2633 = vmatpush3.bf16.msra.mxu1 %v3261_v33 }
 0xdee   :  { %2658 = vmatprep.subr.bf16.mxu1 %v3097_v1 }
 0xdf0   :  { %v2893_v44 = vpop.eup %2892 }
 0xdf1   :  { %834 = vrot.lane.b32.xlu1 %v2893_v44, %s3101_s10 }
 0xe63   :  { %v835_v46 = vpop.permute.xlu1 %834 }
 0xe64   :  { %v837_v48 = vmul.f32 %v835_v46, %v832_v45 }
 0xe66   :  { %v3424_v49 = vadd.f32 %v838_v47, %v837_v48 }
 0xe68   :  { %v908_v50 = vpack.c.bf16 %v3424_v49, %v3424_v49 }
 0xe6a   :  { %v914_v51 = vsel %vm184_vm1, %v911_v41, %v908_v50  ;;  %v1127_v41 = vrot.slane %v3245_v17, 4 }
 0xe6b   :  { %2615 = vmatmul.mubr.msk.bf16.vlgmr.msra.gmra.mrb[20].mxu0 %vm339_vm2, %v914_v51 }
 0xe6c   :  { %2639 = vmatpush3.bf16.msra.mxu0 %v3215_v2  ;;  %2642 = vmatprep.mubr.msk.bf16.mxu0 %vm3098_vm0, %v3097_v1 }
 0xe6d   :  { %2640 = vmatprep.subr.bf16.mxu0 %v3097_v1 }
 0xe70   :  { %2641 = vmatpush3.bf16.msra.mxu0 %v3221_v4 }
 0xe71   :  { %2646 = vmatprep.subr.bf16.mxu0 %v3097_v1 }
 0xeb3   :  { %v1021_v53 = vpop.f32.mrb[20].mxu1 }
 0xeb4   :  { %v1022_v54 = vadd.f32 %v1021_v53, %v983_v52  ;;  %v2624_v55 = vpop.f32.mrb[21].mxu1 }
 0xeb5   :  { %v1024_v56 = vpop.f32.mrb[22].mxu1 }
 0xeb6   :  { %v2625_v57 = vpop.f32.mrb[23].mxu1  ;;  %1034 = vrot.lane.b32.xlu0 %v1022_v54, %s3100_s3  ;;  %v2348_v58 = vmul.f32 -1.442695, %v1022_v54 }
 0xeb8   :  { %2894 = vpow2.f32 %v2348_v58 }
 0xec2   :  { %v2895_v59 = vpop.eup %2894 }
 0xec3   :  { %v1030_v60 = vadd.f32 1.0, %v2895_v59 }
 0xec5   :  { %2896 = vrcp.f32 %v1030_v60 }
 0xecf   :  { %v2897_v62 = vpop.eup %2896 }
 0xed0   :  { %v1044_v21 = vsub.f32 1.0, %v2897_v62  ;;  %v1050_v23 = vmul.f32 %v2897_v62, %v3405_v36 }
 0xf28   :  { %v1035_v63 = vpop.permute.xlu0 %1034 }
 0xf29   :  { %v1037_v0 = vmul.f32 %v2897_v62, %v1035_v63 }
 0xf2b   :  { %1039 = vrot.lane.b32.xlu1 %v1037_v0, %s3093_s21 }
 0xf3e   :  { %v951_v3 = vpop.f32.mrb[20].mxu0 }
 0xf3f   :  { %v952_v5 = vadd.f32 %v3292_v61, %v951_v3  ;;  %v2616_v6 = vpop.f32.mrb[21].mxu0 }
 0xf40   :  { %v954_v7 = vpop.f32.mrb[22].mxu0 }
 0xf41   :  { %964 = vrot.lane.b32.xlu1 %v952_v5, %s3100_s3  ;;  %v2617_v9 = vpop.f32.mrb[23].mxu0  ;;  %v2346_v10 = vmul.f32 -1.442695, %v952_v5 }
 0xf43   :  { %2898 = vpow2.f32 %v2346_v10 }
 0xf4d   :  { %v2899_v14 = vpop.eup %2898 }
 0xf4e   :  { %v960_v15 = vadd.f32 1.0, %v2899_v14 }
 0xf9d   :  { %v1040_v12 = vpop.permute.xlu1 %1039 }
 0xf9e   :  { %v1042_v13 = vadd.f32 %v1040_v12, %v1022_v54 }
 0xfa0   :  { %2900 = vtanh.f32 %v1042_v13 }
 0xfa1   :  { %2902 = vrcp.f32 %v960_v15 }
 0xfaa   :  { %v2901_v16 = vpop.eup %2900 }
 0xfab   :  { %1046 = vrot.lane.b32.xlu0 %v2901_v16, %s3101_s10  ;;  %v2903_v18 = vpop.eup %2902 }
 0xfac   :  { %v974_v34 = vsub.f32 1.0, %v2903_v18  ;;  %v980_v36 = vmul.f32 %v2903_v18, %v3424_v49 }
 0xfb3   :  { %v965_v19 = vpop.permute.xlu1 %964 }
 0xfb4   :  { %v967_v20 = vmul.f32 %v2903_v18, %v965_v19 }
 0xfb6   :  { %969 = vrot.lane.b32.xlu1 %v967_v20, %s3093_s21 }
0x101d   :  { %v1047_v22 = vpop.permute.xlu0 %1046 }
0x101e   :  { %v1049_v11 = vmul.f32 %v1047_v22, %v1044_v21 }
0x1020   :  { %v3444_v24 = vadd.f32 %v1050_v23, %v1049_v11 }
0x1022   :  { %v1052_v25 = vpack.c.bf16 %v3444_v24, %v3444_v24 }
0x1024   :  { %1055 = vrot.lane.b32.xlu0 %v1052_v25, %s3101_s10 }
0x1028   :  { %v970_v26 = vpop.permute.xlu1 %969 }
0x1029   :  { %v972_v27 = vadd.f32 %v970_v26, %v952_v5 }
0x102b   :  { %2904 = vtanh.f32 %v972_v27 }
0x1035   :  { %v2905_v28 = vpop.eup %2904 }
0x1036   :  { %976 = vrot.lane.b32.xlu0 %v2905_v28, %s3101_s10 }
0x1096   :  { %v1056_v31 = vpop.permute.xlu0 %1055 }
0x1097   :  { %2643 = vmatmul.mubr.msk.bf16.vlgmr.msra.gmra.mrb[24].mxu0 %vm184_vm1, %v1056_v31 }
0x1098   :  { %2647 = vmatpush3.bf16.msra.mxu0 %v3249_v29  ;;  %2654 = vmatprep.mubr.msk.bf16.mxu0 %vm3098_vm0, %v3097_v1 }
0x1099   :  { %2648 = vmatprep.subr.bf16.mxu0 %v3097_v1 }
0x109c   :  { %2649 = vmatpush3.bf16.msra.mxu0 %v3252_v30 }
0x109d   :  { %2650 = vmatprep.subr.bf16.mxu0 %v3097_v1 }
0x10a0   :  { %2651 = vmatpush3.bf16.msra.mxu0 %v3256_v32 }
0x10a1   :  { %2652 = vmatprep.subr.bf16.mxu0 %v3097_v1 }
0x10a4   :  { %2653 = vmatpush3.bf16.msra.mxu0 %v3261_v33 }
0x10a5   :  { %2678 = vmatprep.subr.bf16.mxu0 %v3097_v1 }
0x10a8   :  { %v977_v35 = vpop.permute.xlu0 %976 }
0x10a9   :  { %v979_v37 = vmul.f32 %v977_v35, %v974_v34 }
0x10ab   :  { %v981_v38 = vadd.f32 %v980_v36, %v979_v37 }
0x10ad   :  { %v1053_v39 = vpack.c.bf16 %v981_v38, %v981_v38 }
0x10af   :  { %v1059_v40 = vsel %vm184_vm1, %v1056_v31, %v1053_v39 }
0x10b0   :  { %2635 = vmatmul.mubr.msk.bf16.vlgmr.msra.gmra.mrb[24].mxu1 %vm339_vm2, %v1059_v40 }
0x10b1   :  { %2659 = vmatpush3.bf16.msra.mxu1 %v3215_v2  ;;  %2662 = vmatprep.mubr.msk.bf16.mxu1 %vm3098_vm0, %v3097_v1 }
0x10b2   :  { %2660 = vmatprep.subr.bf16.mxu1 %v3097_v1 }
0x10b5   :  { %2661 = vmatpush3.bf16.msra.mxu1 %v3221_v4 }
0x10b6   :  { %2666 = vmatprep.subr.bf16.mxu1 %v3097_v1 }
0x116a   :  { %v1165_v42 = vpop.f32.mrb[24].mxu0 }
0x116b   :  { %v1166_v43 = vadd.f32 %v1165_v42, %v1127_v41  ;;  %v2644_v44 = vpop.f32.mrb[25].mxu0 }
0x116c   :  { %v1168_v45 = vpop.f32.mrb[26].mxu0 }
0x116d   :  { %1178 = vrot.lane.b32.xlu1 %v1166_v43, %s3100_s3  ;;  %v2645_v46 = vpop.f32.mrb[27].mxu0  ;;  %v2352_v4 = vmul.f32 -1.442695, %v1166_v43 }
0x116e   :  { %v3509_v46 = vld [vmem:[#allocation9] sm:$0xff]  }
0x116f   :  { %2906 = vpow2.f32 %v2352_v4 }
0x1179   :  { %v2907_v51 = vpop.eup %2906 }
0x117a   :  { %v1174_v52 = vadd.f32 1.0, %v2907_v51  ;;  %v3521_v51 = vld [vmem:[#allocation9 + $0x18] sm:$0xff]  }
0x117c   :  { %2908 = vrcp.f32 %v1174_v52 }
0x1183   :  { %v1096_v47 = vpop.f32.mrb[24].mxu1 }
0x1184   :  { %v1097_v2 = vadd.f32 %v3292_v61, %v1096_v47  ;;  %v2636_v48 = vpop.f32.mrb[25].mxu1 }
0x1185   :  { %v1099_v49 = vpop.f32.mrb[26].mxu1 }
0x1186   :  { %v2637_v50 = vpop.f32.mrb[27].mxu1  ;;  %1109 = vrot.lane.b32.xlu1 %v1097_v2, %s3100_s3  ;;  %v2350_v53 = vmul.f32 -1.442695, %v1097_v2  ;;  %v2909_v54 = vpop.eup %2908 }
0x1187   :  { %v1188_v9 = vsub.f32 1.0, %v2909_v54  ;;  %v1194_v12 = vmul.f32 %v2909_v54, %v3444_v24  ;;  %v3517_v50 = vld [vmem:[#allocation9 + $0x10] sm:$0xff]  }
0x1188   :  { %2910 = vpow2.f32 %v2350_v53 }
0x1192   :  { %v2911_v57 = vpop.eup %2910 }
0x1193   :  { %v1105_v58 = vadd.f32 1.0, %v2911_v57 }
0x1195   :  { %2912 = vrcp.f32 %v1105_v58 }
0x119f   :  { %v2913_v59 = vpop.eup %2912 }
0x11a0   :  { %v1119_v18 = vsub.f32 1.0, %v2913_v59  ;;  %v1125_v20 = vmul.f32 %v2913_v59, %v981_v38 }
0x11df   :  { %v1179_v55 = vpop.permute.xlu1 %1178 }
0x11e0   :  { %v1181_v56 = vmul.f32 %v2909_v54, %v1179_v55 }
0x11e2   :  { %1183 = vrot.lane.b32.xlu0 %v1181_v56, %s3093_s21 }
0x11f8   :  { %v1110_v60 = vpop.permute.xlu1 %1109 }
0x11f9   :  { %v1112_v62 = vmul.f32 %v2913_v59, %v1110_v60 }
0x11fb   :  { %1114 = vrot.lane.b32.xlu1 %v1112_v62, %s3093_s21  ;;  %v2984_v62 = vld [vmem:[#allocation6 + $0x4] sm:$0xf] }
0x1254   :  { %v1184_v63 = vpop.permute.xlu0 %1183 }
0x1255   :  { %v1186_v0 = vadd.f32 %v1184_v63, %v1166_v43 }
0x1257   :  { %2914 = vtanh.f32 %v1186_v0 }
0x1261   :  { %v2915_v3 = vpop.eup %2914 }
0x1262   :  { %1190 = vrot.lane.b32.xlu0 %v2915_v3, %s3101_s10 }
0x126d   :  { %v1115_v5 = vpop.permute.xlu1 %1114 }
0x126e   :  { %v1117_v6 = vadd.f32 %v1115_v5, %v1097_v2  ;;  %v3513_v2 = vld [vmem:[#allocation9 + $0x8] sm:$0xff]  }
0x1270   :  { %2916 = vtanh.f32 %v1117_v6 }
0x127a   :  { %v2917_v7 = vpop.eup %2916 }
0x127b   :  { %1121 = vrot.lane.b32.xlu1 %v2917_v7, %s3101_s10 }
0x12d4   :  { %v1191_v10 = vpop.permute.xlu0 %1190 }
0x12d5   :  { %v1193_v13 = vmul.f32 %v1191_v10, %v1188_v9 }
0x12d7   :  { %v3479_v14 = vadd.f32 %v1194_v12, %v1193_v13 }
0x12d9   :  { %v1196_v15 = vpack.c.bf16 %v3479_v14, %v3479_v14 }
0x12db   :  { %1199 = vrot.lane.b32.xlu0 %v1196_v15, %s3101_s10 }
0x12ed   :  { %v1122_v16 = vpop.permute.xlu1 %1121 }
0x12ee   :  { %v1124_v19 = vmul.f32 %v1122_v16, %v1119_v18 }
0x12f0   :  { %v3484_v21 = vadd.f32 %v1125_v20, %v1124_v19 }
0x12f2   :  { %v1197_v22 = vpack.c.bf16 %v3484_v21, %v3484_v21 }
0x134d   :  { %v1200_v23 = vpop.permute.xlu0 %1199 }
0x134e   :  { %v1203_v11 = vsel %vm184_vm1, %v1200_v23, %v1197_v22  ;;  %2663 = vmatmul.mubr.msk.bf16.vlgmr.msra.gmra.mrb[28].mxu1 %vm184_vm1, %v1200_v23 }
0x134f   :  { %2655 = vmatmul.mubr.msk.bf16.vlgmr.msra.gmra.mrb[28].mxu0 %vm339_vm2, %v1203_v11  ;;  %2667 = vmatpush3.bf16.msra.mxu1 %v3249_v29  ;;  %v1271_v29 = vrot.slane %v3245_v17, 6 }
0x1350   :  { %2686 = vmatprep.mubr.msk.bf16.mxu0 %vm3098_vm0, %v3097_v1  ;;  %2668 = vmatprep.subr.bf16.mxu1 %v3097_v1 }
0x1351   :  { %2674 = vmatprep.mubr.msk.bf16.mxu1 %vm3098_vm0, %v3097_v1  ;;  %2679 = vmatpush3.bf16.msra.mxu0 %v3509_v46 }
0x1352   :  { %2680 = vmatprep.subr.bf16.mxu0 %v3097_v1 }
0x1353   :  { %2669 = vmatpush3.bf16.msra.mxu1 %v3252_v30 }
0x1354   :  { %2670 = vmatprep.subr.bf16.mxu1 %v3097_v1 }
0x1355   :  { %2681 = vmatpush3.bf16.msra.mxu0 %v3513_v2 }
0x1356   :  { %2682 = vmatprep.subr.bf16.mxu0 %v3097_v1 }
0x1357   :  { %2671 = vmatpush3.bf16.msra.mxu1 %v3256_v32 }
0x1358   :  { %2672 = vmatprep.subr.bf16.mxu1 %v3097_v1 }
0x1359   :  { %2683 = vmatpush3.bf16.msra.mxu0 %v3517_v50 }
0x135a   :  { %2684 = vmatprep.subr.bf16.mxu0 %v3097_v1 }
0x135b   :  { %2673 = vmatpush3.bf16.msra.mxu1 %v3261_v33 }
0x135c   :  { %2690 = vmatprep.subr.bf16.mxu1 %v3097_v1 }
0x135d   :  { %2685 = vmatpush3.bf16.msra.mxu0 %v3521_v51 }
0x135e   :  { %2702 = vmatprep.subr.bf16.mxu0 %v3097_v1 }
0x1421   :  { %v1309_v24 = vpop.f32.mrb[28].mxu1 }
0x1422   :  { %v1310_v25 = vadd.f32 %v1309_v24, %v1271_v29  ;;  %v1240_v26 = vpop.f32.mrb[28].mxu0  ;;  %v2664_v27 = vpop.f32.mrb[29].mxu1 }
0x1423   :  { %v2656_v28 = vpop.f32.mrb[29].mxu0  ;;  %v1312_v31 = vpop.f32.mrb[30].mxu1  ;;  %v1241_v32 = vadd.f32 %v3292_v61, %v1240_v26 }
0x1424   :  { %1322 = vrot.lane.b32.xlu0 %v1310_v25, %s3100_s3  ;;  %v1243_v30 = vpop.f32.mrb[30].mxu0  ;;  %v2665_v34 = vpop.f32.mrb[31].mxu1  ;;  %v2356_v33 = vmul.f32 -1.442695, %v1310_v25 }
0x1425   :  { %v2657_v35 = vpop.f32.mrb[31].mxu0  ;;  %v2354_v36 = vmul.f32 -1.442695, %v1241_v32 }
0x1426   :  { %2918 = vpow2.f32 %v2356_v33 }
0x1427   :  { %2920 = vpow2.f32 %v2354_v36 }
0x1428   :  { %1253 = vrot.lane.b32.xlu0 %v1241_v32, %s3100_s3 }
0x1430   :  { %v2919_v17 = vpop.eup %2918 }
0x1431   :  { %v1318_v37 = vadd.f32 1.0, %v2919_v17  ;;  %v2921_v38 = vpop.eup %2920 }
0x1432   :  { %v1249_v39 = vadd.f32 1.0, %v2921_v38 }
0x1433   :  { %2922 = vrcp.f32 %v1318_v37  ;;  %v3557_v37 = vld [vmem:[#allocation9 + $0x20] sm:$0xff]  }
0x1434   :  { %2924 = vrcp.f32 %v1249_v39 }
0x143d   :  { %v2923_v40 = vpop.eup %2922 }
0x143e   :  { %v2925_v43 = vpop.eup %2924  ;;  %v1332_v54 = vsub.f32 1.0, %v2923_v40  ;;  %v1338_v56 = vmul.f32 %v2923_v40, %v3479_v14  ;;  %v3549_v14 = vld [vmem:[%s3834_s6] ss:$0 sm:$0xff] }
0x143f   :  { %v1263_v5 = vsub.f32 1.0, %v2925_v43  ;;  %v1269_v7 = vmul.f32 %v2925_v43, %v3484_v21 }
0x1496   :  { %v1323_v41 = vpop.permute.xlu0 %1322 }
0x1497   :  { %v1325_v42 = vmul.f32 %v2923_v40, %v1323_v41  ;;  %v3562_v40 = vld [vmem:[#allocation9 + $0x28] sm:$0xff]  }
0x1499   :  { %1327 = vrot.lane.b32.xlu1 %v1325_v42, %s3093_s21  ;;  %v3566_v42 = vld [vmem:[#allocation9 + $0x30] sm:$0xff]  }
0x149a   :  { %v1254_v44 = vpop.permute.xlu0 %1253 }
0x149b   :  { %v1256_v45 = vmul.f32 %v2925_v43, %v1254_v44  ;;  %v3569_v43 = vld [vmem:[#allocation9 + $0x38] sm:$0xff]  }
0x149d   :  { %1258 = vrot.lane.b32.xlu1 %v1256_v45, %s3093_s21 }
0x150b   :  { %v1328_v47 = vpop.permute.xlu1 %1327 }
0x150c   :  { %v1330_v48 = vadd.f32 %v1328_v47, %v1310_v25 }
0x150e   :  { %2926 = vtanh.f32 %v1330_v48 }
0x150f   :  { %v1259_v49 = vpop.permute.xlu1 %1258 }
0x1510   :  { %v1261_v4 = vadd.f32 %v1259_v49, %v1241_v32 }
0x1512   :  { %2928 = vtanh.f32 %v1261_v4 }
0x1518   :  { %v2927_v52 = vpop.eup %2926 }
0x1519   :  { %1334 = vrot.lane.b32.xlu0 %v2927_v52, %s3101_s10 }
0x151c   :  { %v2929_v53 = vpop.eup %2928 }
0x151d   :  { %1265 = vrot.lane.b32.xlu1 %v2929_v53, %s3101_s10 }
0x158b   :  { %v1335_v55 = vpop.permute.xlu0 %1334 }
0x158c   :  { %v1337_v57 = vmul.f32 %v1335_v55, %v1332_v54 }
0x158e   :  { %v3528_v58 = vadd.f32 %v1338_v56, %v1337_v57 }
0x158f   :  { %v1266_v3 = vpop.permute.xlu1 %1265 }
0x1590   :  { %v1340_v59 = vpack.c.bf16 %v3528_v58, %v3528_v58  ;;  %v1268_v6 = vmul.f32 %v1266_v3, %v1263_v5 }
0x1592   :  { %1343 = vrot.lane.b32.xlu0 %v1340_v59, %s3101_s10  ;;  %v1415_v60 = vrot.slane %v1340_v59, 5  ;;  %v3538_v9 = vadd.f32 %v1269_v7, %v1268_v6 }
0x1594   :  { %v1418_v63 = vsel %vm184_vm1, %v2984_v62, %v1415_v60  ;;  %v1341_v10 = vpack.c.bf16 %v3538_v9, %v3538_v9  ;;  %v3600_v62 = vld [vmem:[%s3834_s6 + $0x1] ss:$0 sm:$0xff] }
0x1595   :  { %v1420_v0 = vrot.slane %v1418_v63, 3 }
0x1597   :  { %2687 = vmatmul.mubr.msk.bf16.vlgmr.msra.gmra.mrb[32].mxu0 %vm339_vm2, %v1420_v0 }
0x1598   :  { %2706 = vmatprep.mubr.msk.bf16.mxu0 %vm3098_vm0, %v3097_v1 }
0x1604   :  { %v1344_v12 = vpop.permute.xlu0 %1343 }
0x1605   :  { %v1347_v13 = vsel %vm184_vm1, %v1344_v12, %v1341_v10 }
0x1606   :  { %2675 = vmatmul.mubr.msk.bf16.vlgmr.msra.gmra.mrb[32].mxu1 %vm339_vm2, %v1347_v13 }
0x1607   :  { %2698 = vmatprep.mubr.msk.bf16.mxu1 %vm3098_vm0, %v3097_v1  ;;  %2691 = vmatpush3.bf16.msra.mxu1 %v3557_v37 }
0x1608   :  { %2692 = vmatprep.subr.bf16.mxu1 %v3097_v1 }
0x160b   :  { %2693 = vmatpush3.bf16.msra.mxu1 %v3562_v40 }
0x160c   :  { %2694 = vmatprep.subr.bf16.mxu1 %v3097_v1 }
0x160f   :  { %2695 = vmatpush3.bf16.msra.mxu1 %v3566_v42 }
0x1610   :  { %2696 = vmatprep.subr.bf16.mxu1 %v3097_v1 }
0x1613   :  { %2697 = vmatpush3.bf16.msra.mxu1 %v3569_v43 }
0x1614   :  { %2722 = vmatprep.subr.bf16.mxu1 %v3097_v1 }
0x166a   :  { %v1482_v15 = vpop.f32.mrb[32].mxu0 }
0x166b   :  { %v1483_v16 = vadd.f32 %v3549_v14, %v1482_v15  ;;  %v2688_v18 = vpop.f32.mrb[33].mxu0 }
0x166c   :  { %v1485_v19 = vpop.f32.mrb[34].mxu0 }
0x166d   :  { %1495 = vrot.lane.b32.xlu1 %v1483_v16, %s3100_s3  ;;  %v2689_v20 = vpop.f32.mrb[35].mxu0  ;;  %v2364_v21 = vmul.f32 -1.442695, %v1483_v16  ;;  %v3608_v19 = vld [vmem:[%s3835_s7] sm:$0xff]  }
0x166e   :  { %2703 = vmatpush3.bf16.msra.mxu0 %v3608_v19  ;;  %v3614_v20 = vld [vmem:[%s3835_s7 + $0x8] sm:$0xff]   ;;  %s1671_s7 = sld [smem:[#allocation2]] }
0x166f   :  { %2930 = vpow2.f32 %v2364_v21  ;;  %2704 = vmatprep.subr.bf16.mxu0 %v3097_v1 }
0x1672   :  { %2705 = vmatpush3.bf16.msra.mxu0 %v3614_v20 }
0x1673   :  { %2710 = vmatprep.subr.bf16.mxu0 %v3097_v1 }
0x1674   :  { %p1672_p13 = scmp.eq.s32.totalorder %s1671_s7, 1 }
0x1676   :  { %s1674_s25 = scalar_select %p1672_p13, 1, 0 }
0x1679   :  { %v2931_v22 = vpop.eup %2930 }
0x167a   :  { %v1491_v23 = vadd.f32 1.0, %v2931_v22 }
0x167c   :  { %2932 = vrcp.f32 %v1491_v23 }
0x1686   :  { %v2933_v27 = vpop.eup %2932 }
0x1687   :  { %v1505_v45 = vsub.f32 1.0, %v2933_v27  ;;  %v1511_v48 = vmul.f32 %v2933_v27, %v3528_v58 }
0x16d9   :  { %v1384_v11 = vpop.f32.mrb[32].mxu1 }
0x16da   :  { %v1385_v29 = vadd.f32 %v3292_v61, %v1384_v11  ;;  %v2676_v24 = vpop.f32.mrb[33].mxu1 }
0x16db   :  { %v1387_v25 = vpop.f32.mrb[34].mxu1 }
0x16dc   :  { %1397 = vrot.lane.b32.xlu0 %v1385_v29, %s3100_s3  ;;  %v2677_v26 = vpop.f32.mrb[35].mxu1  ;;  %v2358_v30 = vmul.f32 -1.442695, %v1385_v29 }
0x16de   :  { %2934 = vpow2.f32 %v2358_v30  ;;  %v3643_v30 = vld [vmem:[%s3836_s8] ss:$0 sm:$0xff]  ;;  %s2379_s8 = sld [smem:[#allocation2 + $0x1]] }
0x16df   :  { %v1496_v28 = vpop.permute.xlu1 %1495 }
0x16e0   :  { %v1498_v31 = vmul.f32 %v2933_v27, %v1496_v28  ;;  %v1675_v27 = vstv %s1674_s25 }
0x16e1   :  { %vm1676_vm3 = vcmp.eq.s32.totalorder %v1675_v27, 1 }
0x16e2   :  { %1500 = vrot.lane.b32.xlu1 %v1498_v31, %s3093_s21  ;;  %v1677_v28 = vsel %vm1676_vm3, 1, %v3099_v8 }
0x16e3   :  { %v1678_v31 = vpack.c.b16 %v1677_v28, %v1677_v28 }
0x16e4   :  { %p1873_p0 = scmp.eq.s32.totalorder %s2379_s8, 1 }
0x16e5   :  { %vm1679_vm4 = vcmp.ne.s16.totalorder %v1678_v31, 0 }
0x16e6   :  { %s1875_s30 = scalar_select %p1873_p0, 1, 0 }
0x16e8   :  { %v2935_v34 = vpop.eup %2934 }
0x16e9   :  { %v1393_v35 = vadd.f32 1.0, %v2935_v34 }
0x16eb   :  { %2936 = vrcp.f32 %v1393_v35 }
0x16f5   :  { %v2937_v32 = vpop.eup %2936 }
0x16f6   :  { %v1407_v53 = vsub.f32 1.0, %v2937_v32  ;;  %v1413_v56 = vmul.f32 %v2937_v32, %v3538_v9 }
0x174e   :  { %v1398_v33 = vpop.permute.xlu0 %1397 }
0x174f   :  { %v1400_v36 = vmul.f32 %v2937_v32, %v1398_v33  ;;  %v157_v33 = vld [vmem:[%s3830_s2] sm:$0x1] }
0x1751   :  { %1402 = vrot.lane.b32.xlu0 %v1400_v36, %s3093_s21 }
0x1754   :  { %v1501_v61 = vpop.permute.xlu1 %1500 }
0x1755   :  { %v1503_v17 = vadd.f32 %v1501_v61, %v1483_v16 }
0x1757   :  { %2938 = vtanh.f32 %v1503_v17 }
0x1761   :  { %v2939_v38 = vpop.eup %2938 }
0x1762   :  { %1507 = vrot.lane.b32.xlu1 %v2939_v38, %s3101_s10 }
0x17c3   :  { %v1403_v39 = vpop.permute.xlu0 %1402 }
0x17c4   :  { %v1405_v41 = vadd.f32 %v1403_v39, %v1385_v29 }
0x17c6   :  { %2940 = vtanh.f32 %v1405_v41 }
0x17d0   :  { %v2941_v44 = vpop.eup %2940 }
0x17d1   :  { %1409 = vrot.lane.b32.xlu0 %v2941_v44, %s3101_s10 }
0x17d4   :  { %v1508_v47 = vpop.permute.xlu1 %1507 }
0x17d5   :  { %v1510_v49 = vmul.f32 %v1508_v47, %v1505_v45 }
0x17d7   :  { %v3576_v4 = vadd.f32 %v1511_v48, %v1510_v49 }
0x17d9   :  { %v3580_v52 = vpack.c.bf16 %v3576_v4, %v3576_v4 }
0x17db   :  { %1516 = vrot.lane.b32.xlu1 %v3580_v52, %s3101_s10 }
0x1843   :  { %v1410_v54 = vpop.permute.xlu0 %1409 }
0x1844   :  { %v1412_v55 = vmul.f32 %v1410_v54, %v1407_v53 }
0x1846   :  { %v1414_v57 = vadd.f32 %v1413_v56, %v1412_v55 }
0x1848   :  { %v1514_v59 = vpack.c.bf16 %v1414_v57, %v1414_v57 }
0x184d   :  { %v1517_v60 = vpop.permute.xlu1 %1516 }
0x184e   :  { %v1520_v58 = vsel %vm184_vm1, %v1517_v60, %v1514_v59 }
0x184f   :  { %2699 = vmatmul.mubr.msk.bf16.vlgmr.msra.gmra.mrb[36].mxu1 %vm339_vm2, %v1520_v58 }
0x1850   :  { %2723 = vmatpush3.bf16.msra.mxu1 %v3557_v37  ;;  %2730 = vmatprep.mubr.msk.bf16.mxu1 %vm3098_vm0, %v3097_v1 }
0x1851   :  { %2724 = vmatprep.subr.bf16.mxu1 %v3097_v1 }
0x1854   :  { %2725 = vmatpush3.bf16.msra.mxu1 %v3562_v40 }
0x1855   :  { %2726 = vmatprep.subr.bf16.mxu1 %v3097_v1 }
0x1858   :  { %2727 = vmatpush3.bf16.msra.mxu1 %v3566_v42 }
0x1859   :  { %2728 = vmatprep.subr.bf16.mxu1 %v3097_v1 }
0x185c   :  { %2729 = vmatpush3.bf16.msra.mxu1 %v3569_v43 }
0x185d   :  { %2742 = vmatprep.subr.bf16.mxu1 %v3097_v1 }
0x1922   :  { %v1581_v63 = vpop.f32.mrb[36].mxu1 }
0x1923   :  { %v1582_v0 = vadd.f32 %v3600_v62, %v1581_v63  ;;  %v2700_v3 = vpop.f32.mrb[37].mxu1 }
0x1924   :  { %v1584_v5 = vpop.f32.mrb[38].mxu1 }
0x1925   :  { %1594 = vrot.lane.b32.xlu0 %v1582_v0, %s3100_s3  ;;  %v2701_v6 = vpop.f32.mrb[39].mxu1  ;;  %v2370_v7 = vmul.f32 -1.442695, %v1582_v0 }
0x1927   :  { %2942 = vpow2.f32 %v2370_v7 }
0x1931   :  { %v2943_v9 = vpop.eup %2942 }
0x1932   :  { %v1590_v10 = vadd.f32 1.0, %v2943_v9 }
0x1934   :  { %2944 = vrcp.f32 %v1590_v10 }
0x193e   :  { %v2945_v12 = vpop.eup %2944 }
0x193f   :  { %v1604_v22 = vsub.f32 1.0, %v2945_v12  ;;  %v1610_v11 = vmul.f32 %v2945_v12, %v1414_v57 }
0x1997   :  { %v1595_v13 = vpop.permute.xlu0 %1594 }
0x1998   :  { %v1597_v15 = vmul.f32 %v2945_v12, %v1595_v13 }
0x199a   :  { %1599 = vrot.lane.b32.xlu1 %v1597_v15, %s3093_s21 }
0x1a0c   :  { %v1600_v16 = vpop.permute.xlu1 %1599 }
0x1a0d   :  { %v1602_v18 = vadd.f32 %v1600_v16, %v1582_v0 }
0x1a0f   :  { %2946 = vtanh.f32 %v1602_v18 }
0x1a19   :  { %v2947_v21 = vpop.eup %2946 }
0x1a1a   :  { %1606 = vrot.lane.b32.xlu0 %v2947_v21, %s3101_s10 }
0x1a8c   :  { %v1607_v23 = vpop.permute.xlu0 %1606 }
0x1a8d   :  { %v1609_v29 = vmul.f32 %v1607_v23, %v1604_v22 }
0x1a8f   :  { %v3620_v24 = vadd.f32 %v1610_v11, %v1609_v29 }
0x1a91   :  { %v3624_v25 = vpack.c.bf16 %v3620_v24, %v3620_v24 }
0x1a93   :  { %1614 = vrot.lane.b32.xlu1 %v3624_v25, %s3101_s10 }
0x1b05   :  { %v1615_v26 = vpop.permute.xlu1 %1614 }
0x1b06   :  { %2707 = vmatmul.mubr.msk.bf16.vlgmr.msra.gmra.mrb[36].mxu0 %vm184_vm1, %v1615_v26 }
0x1b07   :  { %2711 = vmatpush3.bf16.msra.mxu0 %v3509_v46  ;;  %2718 = vmatprep.mubr.msk.bf16.mxu0 %vm3098_vm0, %v3097_v1 }
0x1b08   :  { %2712 = vmatprep.subr.bf16.mxu0 %v3097_v1 }
0x1b0b   :  { %2713 = vmatpush3.bf16.msra.mxu0 %v3513_v2 }
0x1b0c   :  { %2714 = vmatprep.subr.bf16.mxu0 %v3097_v1 }
0x1b0f   :  { %2715 = vmatpush3.bf16.msra.mxu0 %v3517_v50 }
0x1b10   :  { %2716 = vmatprep.subr.bf16.mxu0 %v3097_v1 }
0x1b13   :  { %2717 = vmatpush3.bf16.msra.mxu0 %v3521_v51 }
0x1b14   :  { %2734 = vmatprep.subr.bf16.mxu0 %v3097_v1 }
0x1bd9   :  { %v1665_v34 = vpop.f32.mrb[36].mxu0 }
0x1bda   :  { %v3646_v35 = vadd.f32 %v3643_v30, %v1665_v34  ;;  %v2708_v32 = vpop.f32.mrb[37].mxu0 }
0x1bdb   :  { %v1668_v36 = vpop.f32.mrb[38].mxu0 }
0x1bdc   :  { %v1673_v61 = vpack.c.bf16 %v3646_v35, %v3646_v35  ;;  %v2709_v17 = vpop.f32.mrb[39].mxu0 }
0x1bde   :  { %v1680_v38 = vsel %vm1679_vm4, %v157_v33, %v1673_v61 }
0x1bdf   :  { %v1683_v39 = vsel %vm184_vm1, %v1680_v38, %v3580_v52 }
0x1be0   :  { %2719 = vmatmul.mubr.msk.bf16.vlgmr.msra.gmra.mrb[40].mxu0 %vm339_vm2, %v1683_v39 }
0x1be1   :  { %2735 = vmatpush3.bf16.msra.mxu0 %v3608_v19  ;;  %2738 = vmatprep.mubr.msk.bf16.mxu0 %vm3098_vm0, %v3097_v1 }
0x1be2   :  { %2736 = vmatprep.subr.bf16.mxu0 %v3097_v1 }
0x1be5   :  { %2737 = vmatpush3.bf16.msra.mxu0 %v3614_v20 }
0x1be6   :  { %2754 = vmatprep.subr.bf16.mxu0 %v3097_v1 }
0x1cb3   :  { %v1720_v41 = vpop.f32.mrb[40].mxu0 }
0x1cb4   :  { %v1721_v44 = vadd.f32 %v3549_v14, %v1720_v41  ;;  %v2720_v45 = vpop.f32.mrb[41].mxu0 }
0x1cb5   :  { %v1723_v47 = vpop.f32.mrb[42].mxu0 }
0x1cb6   :  { %1733 = vrot.lane.b32.xlu0 %v1721_v44, %s3100_s3  ;;  %v2721_v48 = vpop.f32.mrb[43].mxu0  ;;  %v2375_v49 = vmul.f32 -1.442695, %v1721_v44 }
0x1cb8   :  { %2948 = vpow2.f32 %v2375_v49 }
0x1cc2   :  { %v2949_v52 = vpop.eup %2948 }
0x1cc3   :  { %v1729_v53 = vadd.f32 1.0, %v2949_v52 }
0x1cc5   :  { %2950 = vrcp.f32 %v1729_v53 }
0x1ccf   :  { %v2951_v54 = vpop.eup %2950 }
0x1cd0   :  { %v1743_v58 = vsub.f32 1.0, %v2951_v54  ;;  %v1749_v0 = vmul.f32 %v2951_v54, %v3576_v4 }
0x1d28   :  { %v1734_v55 = vpop.permute.xlu0 %1733 }
0x1d29   :  { %v1736_v56 = vmul.f32 %v2951_v54, %v1734_v55 }
0x1d2b   :  { %1738 = vrot.lane.b32.xlu1 %v1736_v56, %s3093_s21 }
0x1d9d   :  { %v1739_v57 = vpop.permute.xlu1 %1738 }
0x1d9e   :  { %v1741_v59 = vadd.f32 %v1739_v57, %v1721_v44  ;;  %v158_v44 = vld [vmem:[%s3830_s2 + $0x1] sm:$0x1] }
0x1da0   :  { %2952 = vtanh.f32 %v1741_v59 }
0x1daa   :  { %v2953_v60 = vpop.eup %2952 }
0x1dab   :  { %1745 = vrot.lane.b32.xlu0 %v2953_v60, %s3101_s10 }
0x1e1d   :  { %v1746_v63 = vpop.permute.xlu0 %1745 }
0x1e1e   :  { %v1748_v3 = vmul.f32 %v1746_v63, %v1743_v58 }
0x1e20   :  { %v3667_v5 = vadd.f32 %v1749_v0, %v1748_v3 }
0x1e22   :  { %v3671_v6 = vpack.c.bf16 %v3667_v5, %v3667_v5 }
0x1e24   :  { %1753 = vrot.lane.b32.xlu1 %v3671_v6, %s3101_s10 }
0x1e96   :  { %v1754_v7 = vpop.permute.xlu1 %1753 }
0x1e97   :  { %v1757_v9 = vsel %vm184_vm1, %v1754_v7, %v3624_v25 }
0x1e98   :  { %2731 = vmatmul.mubr.msk.bf16.vlgmr.msra.gmra.mrb[40].mxu1 %vm339_vm2, %v1757_v9 }
0x1e99   :  { %2743 = vmatpush3.bf16.msra.mxu1 %v3509_v46  ;;  %2750 = vmatprep.mubr.msk.bf16.mxu1 %vm3098_vm0, %v3097_v1 }
0x1e9a   :  { %2744 = vmatprep.subr.bf16.mxu1 %v3097_v1 }
0x1e9d   :  { %2745 = vmatpush3.bf16.msra.mxu1 %v3513_v2 }
0x1e9e   :  { %2746 = vmatprep.subr.bf16.mxu1 %v3097_v1 }
0x1ea1   :  { %2747 = vmatpush3.bf16.msra.mxu1 %v3517_v50 }
0x1ea2   :  { %2748 = vmatprep.subr.bf16.mxu1 %v3097_v1 }
0x1ea5   :  { %2749 = vmatpush3.bf16.msra.mxu1 %v3521_v51 }
0x1ea6   :  { %2766 = vmatprep.subr.bf16.mxu1 %v3097_v1 }
0x1f6b   :  { %v1794_v4 = vpop.f32.mrb[40].mxu1 }
0x1f6c   :  { %v1795_v10 = vadd.f32 %v3600_v62, %v1794_v4  ;;  %v2732_v12 = vpop.f32.mrb[41].mxu1 }
0x1f6d   :  { %v1797_v13 = vpop.f32.mrb[42].mxu1 }
0x1f6e   :  { %1807 = vrot.lane.b32.xlu0 %v1795_v10, %s3100_s3  ;;  %v2733_v15 = vpop.f32.mrb[43].mxu1  ;;  %v2377_v16 = vmul.f32 -1.442695, %v1795_v10 }
0x1f70   :  { %2954 = vpow2.f32 %v2377_v16 }
0x1f7a   :  { %v2955_v18 = vpop.eup %2954 }
0x1f7b   :  { %v1803_v21 = vadd.f32 1.0, %v2955_v18 }
0x1f7d   :  { %2956 = vrcp.f32 %v1803_v21 }
0x1f87   :  { %v2957_v22 = vpop.eup %2956 }
0x1f88   :  { %v1817_v27 = vsub.f32 1.0, %v2957_v22  ;;  %v1823_v31 = vmul.f32 %v2957_v22, %v3620_v24  ;;  %v1876_v24 = vstv %s1875_s30 }
0x1f89   :  { %vm1877_vm5 = vcmp.eq.s32.totalorder %v1876_v24, 1 }
0x1f8a   :  { %v1878_v61 = vsel %vm1877_vm5, 1, %v3099_v8 }
0x1f8b   :  { %v1879_v17 = vpack.c.b16 %v1878_v61, %v1878_v61 }
0x1f8d   :  { %vm1880_vm6 = vcmp.ne.s16.totalorder %v1879_v17, 0 }
0x1fe0   :  { %v1808_v23 = vpop.permute.xlu0 %1807 }
0x1fe1   :  { %v1810_v11 = vmul.f32 %v2957_v22, %v1808_v23 }
0x1fe3   :  { %1812 = vrot.lane.b32.xlu1 %v1810_v11, %s3093_s21 }
0x2055   :  { %v1813_v29 = vpop.permute.xlu1 %1812 }
0x2056   :  { %v1815_v25 = vadd.f32 %v1813_v29, %v1795_v10 }
0x2058   :  { %2958 = vtanh.f32 %v1815_v25 }
0x2062   :  { %v2959_v26 = vpop.eup %2958 }
0x2063   :  { %1819 = vrot.lane.b32.xlu0 %v2959_v26, %s3101_s10 }
0x20d5   :  { %v1820_v28 = vpop.permute.xlu0 %1819 }
0x20d6   :  { %v1822_v34 = vmul.f32 %v1820_v28, %v1817_v27 }
0x20d8   :  { %v3693_v32 = vadd.f32 %v1823_v31, %v1822_v34 }
0x20da   :  { %v3697_v33 = vpack.c.bf16 %v3693_v32, %v3693_v32 }
0x20dc   :  { %1827 = vrot.lane.b32.xlu1 %v3697_v33, %s3101_s10 }
0x214e   :  { %v1828_v36 = vpop.permute.xlu1 %1827 }
0x214f   :  { %2739 = vmatmul.mubr.msk.bf16.vlgmr.msra.gmra.mrb[44].mxu0 %vm184_vm1, %v1828_v36 }
0x2150   :  { %2755 = vmatpush3.bf16.msra.mxu0 %v3557_v37  ;;  %2762 = vmatprep.mubr.msk.bf16.mxu0 %vm3098_vm0, %v3097_v1 }
0x2151   :  { %2756 = vmatprep.subr.bf16.mxu0 %v3097_v1 }
0x2154   :  { %2757 = vmatpush3.bf16.msra.mxu0 %v3562_v40 }
0x2155   :  { %2758 = vmatprep.subr.bf16.mxu0 %v3097_v1 }
0x2158   :  { %2759 = vmatpush3.bf16.msra.mxu0 %v3566_v42 }
0x2159   :  { %2760 = vmatprep.subr.bf16.mxu0 %v3097_v1 }
0x215c   :  { %2761 = vmatpush3.bf16.msra.mxu0 %v3569_v43 }
0x215d   :  { %2774 = vmatprep.subr.bf16.mxu0 %v3097_v1 }
0x2222   :  { %v1866_v38 = vpop.f32.mrb[44].mxu0 }
0x2223   :  { %v3714_v39 = vadd.f32 %v3643_v30, %v1866_v38  ;;  %v2740_v41 = vpop.f32.mrb[45].mxu0 }
0x2224   :  { %v1869_v45 = vpop.f32.mrb[46].mxu0 }
0x2225   :  { %v1874_v47 = vpack.c.bf16 %v3714_v39, %v3714_v39  ;;  %v2741_v48 = vpop.f32.mrb[47].mxu0 }
0x2227   :  { %v1881_v49 = vsel %vm1880_vm6, %v158_v44, %v1874_v47 }
0x2228   :  { %v1884_v52 = vsel %vm184_vm1, %v1881_v49, %v3671_v6 }
0x2229   :  { %2751 = vmatmul.mubr.msk.bf16.vlgmr.msra.gmra.mrb[44].mxu1 %vm339_vm2, %v1884_v52 }
0x222a   :  { %2767 = vmatpush3.bf16.msra.mxu1 %v3608_v19  ;;  %2770 = vmatprep.mubr.msk.bf16.mxu1 %vm3098_vm0, %v3097_v1 }
0x222b   :  { %2768 = vmatprep.subr.bf16.mxu1 %v3097_v1 }
0x222e   :  { %2769 = vmatpush3.bf16.msra.mxu1 %v3614_v20 }
0x222f   :  { %2786 = vmatprep.subr.bf16.mxu1 %v3097_v1 }
0x22fc   :  { %v1921_v53 = vpop.f32.mrb[44].mxu1 }
0x22fd   :  { %v1922_v54 = vadd.f32 %v3549_v14, %v1921_v53  ;;  %v2752_v55 = vpop.f32.mrb[45].mxu1 }
0x22fe   :  { %v1924_v56 = vpop.f32.mrb[46].mxu1 }
0x22ff   :  { %1934 = vrot.lane.b32.xlu0 %v1922_v54, %s3100_s3  ;;  %v2753_v57 = vpop.f32.mrb[47].mxu1  ;;  %v2381_v59 = vmul.f32 -1.442695, %v1922_v54 }
0x2301   :  { %2960 = vpow2.f32 %v2381_v59 }
0x230b   :  { %v2961_v60 = vpop.eup %2960 }
0x230c   :  { %v1930_v58 = vadd.f32 1.0, %v2961_v60 }
0x230e   :  { %2962 = vrcp.f32 %v1930_v58 }
0x2318   :  { %v2963_v63 = vpop.eup %2962 }
0x2319   :  { %v1944_v4 = vsub.f32 1.0, %v2963_v63  ;;  %v1950_v12 = vmul.f32 %v2963_v63, %v3667_v5 }
0x2371   :  { %v1935_v0 = vpop.permute.xlu0 %1934 }
0x2372   :  { %v1937_v3 = vmul.f32 %v2963_v63, %v1935_v0 }
0x2374   :  { %1939 = vrot.lane.b32.xlu1 %v1937_v3, %s3093_s21 }
0x23e6   :  { %v1940_v6 = vpop.permute.xlu1 %1939 }
0x23e7   :  { %v1942_v7 = vadd.f32 %v1940_v6, %v1922_v54 }
0x23e9   :  { %2964 = vtanh.f32 %v1942_v7 }
0x23f3   :  { %v2965_v9 = vpop.eup %2964 }
0x23f4   :  { %1946 = vrot.lane.b32.xlu0 %v2965_v9, %s3101_s10 }
0x2466   :  { %v1947_v10 = vpop.permute.xlu0 %1946 }
0x2467   :  { %v1949_v13 = vmul.f32 %v1947_v10, %v1944_v4 }
0x2469   :  { %v3735_v15 = vadd.f32 %v1950_v12, %v1949_v13 }
0x246b   :  { %v3739_v16 = vpack.c.bf16 %v3735_v15, %v3735_v15 }
0x246d   :  { %1954 = vrot.lane.b32.xlu1 %v3739_v16, %s3101_s10 }
0x24df   :  { %v1955_v18 = vpop.permute.xlu1 %1954 }
0x24e0   :  { %v1958_v21 = vsel %vm184_vm1, %v1955_v18, %v3697_v33 }
0x24e1   :  { %2763 = vmatmul.mubr.msk.bf16.vlgmr.msra.gmra.mrb[48].mxu0 %vm339_vm2, %v1958_v21 }
0x24e2   :  { %2775 = vmatpush3.bf16.msra.mxu0 %v3509_v46  ;;  %2782 = vmatprep.mubr.msk.bf16.mxu0 %vm3098_vm0, %v3097_v1 }
0x24e3   :  { %2776 = vmatprep.subr.bf16.mxu0 %v3097_v1 }
0x24e6   :  { %2777 = vmatpush3.bf16.msra.mxu0 %v3513_v2 }
0x24e7   :  { %2778 = vmatprep.subr.bf16.mxu0 %v3097_v1 }
0x24ea   :  { %2779 = vmatpush3.bf16.msra.mxu0 %v3517_v50 }
0x24eb   :  { %2780 = vmatprep.subr.bf16.mxu0 %v3097_v1 }
0x24ee   :  { %2781 = vmatpush3.bf16.msra.mxu0 %v3521_v51 }
0x24ef   :  { %2798 = vmatprep.subr.bf16.mxu0 %v3097_v1 }
0x25b4   :  { %v1995_v5 = vpop.f32.mrb[48].mxu0 }
0x25b5   :  { %v1996_v46 = vadd.f32 %v3600_v62, %v1995_v5  ;;  %v2764_v22 = vpop.f32.mrb[49].mxu0 }
0x25b6   :  { %v1998_v23 = vpop.f32.mrb[50].mxu0 }
0x25b7   :  { %2008 = vrot.lane.b32.xlu0 %v1996_v46, %s3100_s3  ;;  %v2765_v11 = vpop.f32.mrb[51].mxu0  ;;  %v2383_v29 = vmul.f32 -1.442695, %v1996_v46 }
0x25b9   :  { %2966 = vpow2.f32 %v2383_v29 }
0x25c3   :  { %v2967_v2 = vpop.eup %2966 }
0x25c4   :  { %v2004_v25 = vadd.f32 1.0, %v2967_v2 }
0x25c6   :  { %2968 = vrcp.f32 %v2004_v25 }
0x25d0   :  { %v2969_v50 = vpop.eup %2968 }
0x25d1   :  { %v2018_v34 = vsub.f32 1.0, %v2969_v50  ;;  %v2024_v36 = vmul.f32 %v2969_v50, %v3693_v32  ;;  %v2077_v32 = vstv %s2076_s15 }
0x25d2   :  { %vm2078_vm7 = vcmp.eq.s32.totalorder %v2077_v32, 1 }
0x2629   :  { %v2009_v26 = vpop.permute.xlu0 %2008 }
0x262a   :  { %v2011_v27 = vmul.f32 %v2969_v50, %v2009_v26 }
0x262c   :  { %2013 = vrot.lane.b32.xlu1 %v2011_v27, %s3093_s21 }
0x269e   :  { %v2014_v51 = vpop.permute.xlu1 %2013 }
0x269f   :  { %v2016_v28 = vadd.f32 %v2014_v51, %v1996_v46 }
0x26a1   :  { %2970 = vtanh.f32 %v2016_v28 }
0x26ab   :  { %v2971_v31 = vpop.eup %2970 }
0x26ac   :  { %2020 = vrot.lane.b32.xlu0 %v2971_v31, %s3101_s10 }
0x271e   :  { %v2021_v33 = vpop.permute.xlu0 %2020 }
0x271f   :  { %v2023_v24 = vmul.f32 %v2021_v33, %v2018_v34 }
0x2721   :  { %v3761_v61 = vadd.f32 %v2024_v36, %v2023_v24 }
0x2723   :  { %v3765_v17 = vpack.c.bf16 %v3761_v61, %v3761_v61 }
0x2725   :  { %2028 = vrot.lane.b32.xlu1 %v3765_v17, %s3101_s10 }
0x2797   :  { %v2029_v38 = vpop.permute.xlu1 %2028 }
0x2798   :  { %2771 = vmatmul.mubr.msk.bf16.vlgmr.msra.gmra.mrb[48].mxu1 %vm184_vm1, %v2029_v38 }
0x2799   :  { %2787 = vmatpush3.bf16.msra.mxu1 %v3557_v37  ;;  %2794 = vmatprep.mubr.msk.bf16.mxu1 %vm3098_vm0, %v3097_v1  ;;  %v2079_v37 = vsel %vm2078_vm7, 1, %v3099_v8 }
0x279a   :  { %2788 = vmatprep.subr.bf16.mxu1 %v3097_v1  ;;  %v2080_v41 = vpack.c.b16 %v2079_v37, %v2079_v37 }
0x279c   :  { %vm2081_vm8 = vcmp.ne.s16.totalorder %v2080_v41, 0 }
0x279d   :  { %2789 = vmatpush3.bf16.msra.mxu1 %v3562_v40 }
0x279e   :  { %2790 = vmatprep.subr.bf16.mxu1 %v3097_v1 }
0x27a1   :  { %2791 = vmatpush3.bf16.msra.mxu1 %v3566_v42  ;;  %v159_v42 = vld [vmem:[%s3830_s2 + $0x2] sm:$0x1]  ;;  %s3102_s2 = smov 1  }
0x27a2   :  { %2792 = vmatprep.subr.bf16.mxu1 %v3097_v1 }
0x27a5   :  { %2793 = vmatpush3.bf16.msra.mxu1 %v3569_v43 }
0x286b   :  { %v2067_v44 = vpop.f32.mrb[48].mxu1 }
0x286c   :  { %v3781_v45 = vadd.f32 %v3643_v30, %v2067_v44  ;;  %v2772_v40 = vpop.f32.mrb[49].mxu1 }
0x286d   :  { %v2070_v47 = vpop.f32.mrb[50].mxu1 }
0x286e   :  { %v2075_v43 = vpack.c.bf16 %v3781_v45, %v3781_v45  ;;  %v2773_v48 = vpop.f32.mrb[51].mxu1 }
0x2870   :  { %v2082_v49 = vsel %vm2081_vm8, %v159_v42, %v2075_v43 }
0x2871   :  { %v2085_v8 = vsel %vm184_vm1, %v2082_v49, %v3739_v16 }
0x2872   :  { %2783 = vmatmul.mubr.msk.bf16.vlgmr.msra.gmra.mrb[52].mxu0 %vm339_vm2, %v2085_v8 }
0x2873   :  { %2799 = vmatpush3.bf16.msra.mxu0 %v3608_v19  ;;  %2802 = vmatprep.mubr.msk.bf16.mxu0 %vm3098_vm0, %v3097_v1 }
0x2874   :  { %2800 = vmatprep.subr.bf16.mxu0 %v3097_v1 }
0x2877   :  { %2801 = vmatpush3.bf16.msra.mxu0 %v3614_v20 }
0x2945   :  { %v2122_v52 = vpop.f32.mrb[52].mxu0 }
0x2946   :  { %v2123_v53 = vadd.f32 %v3549_v14, %v2122_v52  ;;  %v2784_v54 = vpop.f32.mrb[53].mxu0 }
0x2947   :  { %v2125_v55 = vpop.f32.mrb[54].mxu0 }
0x2948   :  { %2135 = vrot.lane.b32.xlu0 %v2123_v53, %s3100_s3  ;;  %v2785_v56 = vpop.f32.mrb[55].mxu0  ;;  %v2387_v57 = vmul.f32 -1.442695, %v2123_v53 }
0x294a   :  { %2972 = vpow2.f32 %v2387_v57 }
0x2954   :  { %v2973_v59 = vpop.eup %2972 }
0x2955   :  { %v2131_v60 = vadd.f32 1.0, %v2973_v59 }
0x2957   :  { %2974 = vrcp.f32 %v2131_v60 }
0x2961   :  { %v2975_v19 = vpop.eup %2974 }
0x2962   :  { %v2145_v14 = vsub.f32 1.0, %v2975_v19  ;;  %v2151_v6 = vmul.f32 %v2975_v19, %v3735_v15 }
0x29ba   :  { %v2136_v58 = vpop.permute.xlu0 %2135 }
0x29bb   :  { %v2138_v63 = vmul.f32 %v2975_v19, %v2136_v58 }
0x29bd   :  { %2140 = vrot.lane.b32.xlu1 %v2138_v63, %s3093_s21 }
0x2a2f   :  { %v2141_v1 = vpop.permute.xlu1 %2140 }
0x2a30   :  { %v2143_v20 = vadd.f32 %v2141_v1, %v2123_v53 }
0x2a32   :  { %2976 = vtanh.f32 %v2143_v20 }
0x2a3c   :  { %v2977_v0 = vpop.eup %2976 }
0x2a3d   :  { %2147 = vrot.lane.b32.xlu0 %v2977_v0, %s3101_s10 }
0x2aaf   :  { %v2148_v3 = vpop.permute.xlu0 %2147 }
0x2ab0   :  { %v2150_v7 = vmul.f32 %v2148_v3, %v2145_v14 }
0x2ab2   :  { %v2152_v9 = vadd.f32 %v2151_v6, %v2150_v7 }
0x2ab4   :  { %v2153_v4 = vpack.c.bf16 %v2152_v9, %v2152_v9 }
0x2ab6   :  { %2155 = vrot.lane.b32.xlu1 %v2153_v4, %s3101_s10 }
0x2b28   :  { %v2156_v10 = vpop.permute.xlu1 %2155 }
0x2b29   :  { %v2159_v12 = vsel %vm184_vm1, %v2156_v10, %v3765_v17 }
0x2b2a   :  { %2795 = vmatmul.mubr.msk.bf16.vlgmr.msra.gmra.mrb[52].mxu1 %vm339_vm2, %v2159_v12 }
0x2bfd   :  { %v2196_v13 = vpop.f32.mrb[52].mxu1 }
0x2bfe   :  { %v2197_v16 = vadd.f32 %v3600_v62, %v2196_v13  ;;  %v2796_v18 = vpop.f32.mrb[53].mxu1 }
0x2bff   :  { %v2199_v21 = vpop.f32.mrb[54].mxu1 }
0x2c00   :  { %2209 = vrot.lane.b32.xlu0 %v2197_v16, %s3100_s3  ;;  %v2797_v5 = vpop.f32.mrb[55].mxu1  ;;  %v2389_v15 = vmul.f32 -1.442695, %v2197_v16  ;;  %s2300_s3 = sshll.u32 %s3105_s22, 4  ;;  %s2301_s3 = int_to_ptr.vmem [resolvable:$true] %s2300_s3 }
0x2c01   :  { %p3066_p3 = scmp.lt.s32.totalorder %s2301_s3, %s2301_s3 }
0x2c02   :  { %2978 = vpow2.f32 %v2389_v15 }
0x2c0c   :  { %v2979_v46 = vpop.eup %2978 }
0x2c0d   :  { %v2205_v22 = vadd.f32 1.0, %v2979_v46 }
0x2c0f   :  { %2980 = vrcp.f32 %v2205_v22 }
0x2c19   :  { %v2981_v23 = vpop.eup %2980 }
0x2c1a   :  { %v2219_v62 = vsub.f32 1.0, %v2981_v23  ;;  %v2225_v27 = vmul.f32 %v2981_v23, %v3761_v61 }
0x2c72   :  { %v2210_v11 = vpop.permute.xlu0 %2209 }
0x2c73   :  { %v2212_v29 = vmul.f32 %v2981_v23, %v2210_v11 }
0x2c75   :  { %2214 = vrot.lane.b32.xlu1 %v2212_v29, %s3093_s21  ;;  %s3104_s21 = smov 3  }
0x2ce7   :  { %v2215_v2 = vpop.permute.xlu1 %2214 }
0x2ce8   :  { %v2217_v25 = vadd.f32 %v2215_v2, %v2197_v16 }
0x2cea   :  { %2982 = vtanh.f32 %v2217_v25 }
0x2cf4   :  { %v2983_v50 = vpop.eup %2982 }
0x2cf5   :  { %2221 = vrot.lane.b32.xlu0 %v2983_v50, %s3101_s10 }
0x2cf9   :  { %2275 = vrot.lane.b32.xlu0 %v3714_v39, %s3102_s2 }
0x2d67   :  { %v2222_v26 = vpop.permute.xlu0 %2221 }
0x2d68   :  { %v2224_v51 = vmul.f32 %v2222_v26, %v2219_v62 }
0x2d6a   :  { %v2226_v28 = vadd.f32 %v2225_v27, %v2224_v51 }
0x2d6b   :  { %v2276_v61 = vpop.permute.xlu0 %2275 }
0x2d6c   :  { %v2227_v31 = vpack.c.bf16 %v2226_v28, %v2226_v28  ;;  %v2287_v32 = vsel %vm2286_vm9, %v3646_v35, %v2276_v61 }
0x2d6e   :  { %2229 = vrot.lane.b32.xlu1 %v2227_v31, %s3101_s10  ;;  %s3061_s10 = scalar_lea.vmem %s2301_s3, 32 }
0x2d6f   :  { %p3062_p2 = scmp.ne.s32.totalorder %s2301_s3, %s3061_s10  ;;  %p3067_p4 = scmp.lt.s32.totalorder %s3061_s10, %s3061_s10 }
0x2d71   :  { %p3068_p5 = por %p3067_p4, %p3066_p3 }
0x2d72   :  { %2279 = vrot.lane.b32.xlu1 %v3781_v45, %s3103_s5 }
0x2d73   :  { %p3069_p6 = pnand %p3068_p5, %p3062_p2 }
0x2de0   :  { %v2230_v34 = vpop.permute.xlu1 %2229 }
0x2de1   :  { %2803 = vmatmul.mubr.msk.bf16.vlgmr.msra.gmra.mrb[56].mxu0 %vm184_vm1, %v2230_v34 }
0x2de4   :  { %v2280_v38 = vpop.permute.xlu1 %2279 }
0x2de5   :  { %v2289_v37 = vsel %vm2288_vm10, %v2287_v32, %v2280_v38 }
0x2eb4   :  { %v2268_v33 = vpop.f32.mrb[56].mxu0 }
0x2eb5   :  { %v2269_v36 = vadd.f32 %v3643_v30, %v2268_v33  ;;  %v2804_v24 = vpop.f32.mrb[57].mxu0 }
0x2eb6   :  { %v2271_v39 = vpop.f32.mrb[58].mxu0 }
0x2eb7   :  { %2283 = vrot.lane.b32.xlu0 %v2269_v36, %s3104_s21  ;;  %v2805_v17 = vpop.f32.mrb[59].mxu0 }
0x2f29   :  { %v2284_v41 = vpop.permute.xlu0 %2283 }
0x2f2a   :  { %v2291_v44 = vsel %vm2290_vm11, %v2289_v37, %v2284_v41 }
0x2f2b   :  { %2293 = vst.msk [vmem:[#allocation10] sm:$0x3] %vm2292_vm12, %v2291_v44 }
0x2f2c   :  { %3072 = shalt.err (!%p3069_p6)
}
0x2f2d   :  { %s3073_s4 = scalar_lea.hbm %s3837_s9, 32 }
0x2f2e   :  { %p3074_p7 = scmp.ne.s32.totalorder %s3837_s9, %s3073_s4  ;;  %p3077_p8 = scmp.lt.u32.totalorder %s3073_s4, %s3837_s9 }
0x2f30   :  { %p3079_p9 = pnand %p3077_p8, %p3074_p7 }
0x2f32   :  { %3082 = shalt.err (!%p3079_p9)
}
0x2f33   :  { %2303 = dma.vmem_to_hbm [thread:$0]  %s2301_s3, 32, %s3837_s9, [#allocation4]  }
0x2f34   :  { %3089 = dma.done.wait [#allocation4], 32  }
0x2f35   :  { %3090 = vsyncadd [#allocation4], 4294967264 }
0x2f36   :  { %2307 = vsyncpa [#allocation3], 1 }
0x2f37   :  { %2308 = vsyncpa [#allocation8], 1 }
0x2f38   :  { %2309 = vsyncpa [#allocation4], 1 }
0x2f39   :  { %2310 = vsyncpa [#allocation5], 1 }

</bundles_post_ra>
